<compile_context>
chip_gen: v6e
topology: v6e:2x2x1
jax: 0.10.0
libtpu: 0.0.40
codegen_flags: <defaults>
</compile_context>

<pallas_src>
import numpy as np
import jax
import jax.numpy as jnp
from jax.experimental import pallas as pl
from jax.experimental.pallas import tpu as pltpu


def _round_up(x, m):
    return ((x + m - 1) // m) * m


def _fourier_basis(n_fft):
    """Periodic-Hamming-windowed DFT basis (f32): cos (N,F) and -sin (N,F)."""
    N = n_fft
    F = N // 2 + 1
    n = np.arange(N, dtype=np.float64)
    k = np.arange(F, dtype=np.float64)
    window = 0.54 - 0.46 * np.cos(2.0 * np.pi * n / N)  # torch.hamming_window (periodic)
    ang = 2.0 * np.pi * np.outer(n, k) / N              # (N, F)
    cos_b = (window[:, None] * np.cos(ang)).astype(np.float32)
    sin_b = (-window[:, None] * np.sin(ang)).astype(np.float32)
    return cos_b, sin_b


def _atan2(y, x):
    """atan2 via a minimax polynomial on [0,1] + quadrant fixup (VPU/EUP only)."""
    ax = jnp.abs(x)
    ay = jnp.abs(y)
    mx = jnp.maximum(ax, ay)
    mn = jnp.minimum(ax, ay)
    # ratio in [0,1]; EUP approximate reciprocal keeps the divide off the VALU.
    a = mn * pl.reciprocal(jnp.maximum(mx, 1e-30), approx=True)
    s = a * a
    r = ((((-0.013480470 * s + 0.057477314) * s - 0.121239071) * s
          + 0.195635925) * s - 0.332994597) * s + 0.999995630
    r = r * a                                # ~atan(a)
    r = jnp.where(ay > ax, (0.5 * np.pi) - r, r)
    r = jnp.where(x < 0.0, np.pi - r, r)
    return jnp.where(y < 0.0, -r, r)


def conv_stft(signal, n_fft, hop_length, tile_t=256):
    """signal: (B, L) float32 -> mix: (B, n_fft//2+1, T, 2) float32 (mag, phase)."""
    B, L = signal.shape
    N = n_fft
    hop = hop_length
    F = N // 2 + 1
    F_pad = _round_up(F, 128)                # MXU-friendly lane width for the basis
    F_sub = _round_up(F, 8)                  # sublane-padded output rows (F-major out)
    pad = N // 2

    # TODO(synk): in-kernel framing assumes hop divides n_fft (true for the usual
    # 50%/75% overlap settings); other hop values would need gcd-based chunking.
    assert N % hop == 0, "conv_stft kernel requires n_fft % hop_length == 0"
    R = N // hop                             # chunks per frame (overlap factor)

    # ---- host-side geometry (plain JAX glue) --------------------------------
    padded = jnp.pad(signal, ((0, 0), (pad, pad)), mode="reflect")   # (B, Lp)
    Lp = L + 2 * pad
    T = 1 + (Lp - N) // hop                  # == torch.stft frame count

    SUB_PAD = 8                              # overlap rows peeked from next tile
    while SUB_PAD < R - 1:
        SUB_PAD *= 2
    assert tile_t % 128 == 0 and tile_t >= 128
    TILE_T = min(tile_t, _round_up(T, 128))  # frames per grid step (lane-dense out)
    assert TILE_T % SUB_PAD == 0, "overlap factor too large for the frame tile"
    n_tt = -(-T // TILE_T)
    T_pad = n_tt * TILE_T
    C_pad = T_pad + SUB_PAD                  # chunk rows the kernel may touch

    total = C_pad * hop
    if Lp >= total:
        flat = padded[:, :total]
    else:
        flat = jnp.pad(padded, ((0, 0), (0, total - Lp)))
    # chunk c = samples [c*hop, (c+1)*hop); bf16 halves input DMA (MXU input is
    # bf16 anyway, so this is numerically free).
    chunks = flat.reshape(B, C_pad, hop).astype(jnp.bfloat16)        # (B, C_pad, hop)

    # Fused, lane-padded basis: columns [0,F) = cos, [F_pad, F_pad+F) = -sin.
    cos_b, sin_b = _fourier_basis(N)
    basis_np = np.zeros((N, 2 * F_pad), dtype=np.float32)
    basis_np[:, :F] = cos_b
    basis_np[:, F_pad:F_pad + F] = sin_b
    basis = jnp.asarray(basis_np).astype(jnp.bfloat16)               # (N, 2*F_pad)

    # ---- Pallas kernel -------------------------------------------------------
    def _kernel(cur_ref, nxt_ref, basis_ref, mag_ref, phase_ref, frame_ref):
        # cur_ref  : (TILE_T, hop)   bf16  chunk rows [t0, t0+TILE_T)
        # nxt_ref  : (SUB_PAD, hop)  bf16  chunk rows [t0+TILE_T, t0+TILE_T+SUB_PAD)
        # basis_ref: (N, 2*F_pad)    bf16  fused [cos | -sin] basis
        # mag_ref / phase_ref: (F_sub, TILE_T) f32   (F-major, lane = time)
        # frame_ref: (TILE_T, N)     f32 scratch holding the assembled frames
        #
        # Assemble frame[t] = padded[t*hop : t*hop + N]:
        #   column block s of the frame tile is chunk rows shifted down by s.
        # All shifted (unaligned-sublane) accesses are done on f32 scratch.
        frame_ref[:, 0:hop] = cur_ref[...].astype(jnp.float32)
        if R > 1:
            nxt = nxt_ref[...].astype(jnp.float32)
        for s in range(1, R):
            lo, hi = s * hop, (s + 1) * hop
            frame_ref[0:TILE_T - s, lo:hi] = frame_ref[s:TILE_T, 0:hop]
            frame_ref[TILE_T - s:TILE_T, lo:hi] = nxt[0:s, :]

        # One full-depth K = n_fft matmul against the fused basis.
        acc = jnp.dot(frame_ref[...].astype(jnp.bfloat16), basis_ref[...],
                      preferred_element_type=jnp.float32)            # (TILE_T, 2*F_pad)

        # Transpose to F-major in-kernel (XLU has slack; output stays lane-dense
        # along time) and drop the lane padding before the HBM store.
        realT = acc[:, 0:F_pad].T[0:F_sub, :]                        # (F_sub, TILE_T)
        imagT = acc[:, F_pad:2 * F_pad].T[0:F_sub, :]
        mag_ref[...] = jnp.sqrt(realT * realT + imagT * imagT)
        phase_ref[...] = _atan2(imagT, realT)

    mag_p, phase_p = pl.pallas_call(
        _kernel,
        out_shape=(jax.ShapeDtypeStruct((B, F_sub, T_pad), jnp.float32),
                   jax.ShapeDtypeStruct((B, F_sub, T_pad), jnp.float32)),
        grid=(n_tt, B),
        in_specs=[
            pl.BlockSpec((None, TILE_T, hop), lambda t, b: (b, t, 0)),
            pl.BlockSpec((None, SUB_PAD, hop),
                         lambda t, b: (b, (t + 1) * (TILE_T // SUB_PAD), 0)),
            pl.BlockSpec((N, 2 * F_pad), lambda t, b: (0, 0)),
        ],
        out_specs=[
            pl.BlockSpec((None, F_sub, TILE_T), lambda t, b: (b, 0, t)),
            pl.BlockSpec((None, F_sub, TILE_T), lambda t, b: (b, 0, t)),
        ],
        scratch_shapes=[pltpu.VMEM((TILE_T, N), jnp.float32)],
        compiler_params=pltpu.CompilerParams(
            dimension_semantics=("parallel", "parallel")),
    )(chunks, chunks, basis)

    # ---- back to torch layout: (B, F, T, 2) ----------------------------------
    # Kernel already emitted (B, F, T); only the torch-mandated interleave of
    # (mag, phase) on the last axis remains (single fused XLA pass).
    return jnp.stack((mag_p[:, :F, :T], phase_p[:, :F, :T]), axis=-1)


if __name__ == "__main__":
    n_fft, hop_length = 256, 128
    B, L = 2, 1024

    key = jax.random.PRNGKey(0)
    signal = jax.random.normal(key, (B, L), dtype=jnp.float32)

    mix = conv_stft(signal, n_fft, hop_length)
    mix = jax.block_until_ready(mix)

    # ---- reference: identical math (bf16-rounded inputs, f32 accumulation) ----
    N, hop = n_fft, hop_length
    F = N // 2 + 1
    pad = N // 2
    padded = jnp.pad(signal, ((0, 0), (pad, pad)), mode="reflect")
    T = 1 + (padded.shape[1] - N) // hop
    gidx = np.arange(T)[:, None] * hop + np.arange(N)[None, :]
    frames = padded[:, gidx].astype(jnp.bfloat16).astype(jnp.float32)   # (B,T,N)
    cos_b, sin_b = _fourier_basis(N)
    cb = jnp.asarray(cos_b).astype(jnp.bfloat16).astype(jnp.float32)
    sb = jnp.asarray(sin_b).astype(jnp.bfloat16).astype(jnp.float32)
    real_ref = jnp.einsum("btn,nf->btf", frames, cb,
                          precision=jax.lax.Precision.HIGHEST)
    imag_ref = jnp.einsum("btn,nf->btf", frames, sb,
                          precision=jax.lax.Precision.HIGHEST)
    mag_ref = jnp.transpose(jnp.sqrt(real_ref ** 2 + imag_ref ** 2), (0, 2, 1))
    phase_ref = jnp.transpose(jnp.arctan2(imag_ref, real_ref), (0, 2, 1))

    assert mix.shape == (B, F, T, 2), mix.shape

    scale = float(jnp.max(mag_ref)) + 1e-6
    mag_err = float(jnp.max(jnp.abs(mix[..., 0] - mag_ref)))
    assert mag_err < 1e-3 * scale + 1e-5, f"magnitude mismatch: {mag_err} (scale {scale})"

    # Phase: compare only well-conditioned bins, wrap-aware around +/- pi.
    mask = mag_ref > 1e-2 * scale
    d = jnp.abs(mix[..., 1] - phase_ref)
    d = jnp.minimum(d, 2.0 * np.pi - d)
    ph_err = float(jnp.max(jnp.where(mask, d, 0.0)))
    assert ph_err < 1e-2, f"phase mismatch: {ph_err}"

    print("KERNEL_OK")
</pallas_src>

<mosaic_0001>
module attributes {stable_mosaic.version = 11 : i64} {
  func.func @_kernel(%arg0: i32, %arg1: i32, %arg2: memref<1x128x128xbf16, #tpu.memory_space<vmem>>, %arg3: memref<1x8x128xbf16, #tpu.memory_space<vmem>>, %arg4: memref<256x512xbf16, #tpu.memory_space<vmem>>, %arg5: memref<1x136x128xf32, #tpu.memory_space<vmem>>, %arg6: memref<1x136x128xf32, #tpu.memory_space<vmem>>, %arg7: memref<128x256xf32, #tpu.memory_space<vmem>>) attributes {dimension_semantics = [#tpu.dimension_semantics<parallel>, #tpu.dimension_semantics<parallel>], iteration_bounds = array<i64: 1, 2>, scalar_prefetch = 0 : i64, scratch_operands = 1 : i64, tpu.core_type = #tpu.core_type<tc>, window_params = [{transform_indices = @transform_0, window_bounds = array<i64: 1, 128, 128>}, {transform_indices = @transform_1, window_bounds = array<i64: 1, 8, 128>}, {pipeline_mode = #tpu.pipeline_mode<synchronous>, transform_indices = @transform_2, window_bounds = array<i64: 256, 512>}, {transform_indices = @transform_3, window_bounds = array<i64: 1, 136, 128>}, {transform_indices = @transform_4, window_bounds = array<i64: 1, 136, 128>}]} {
    %c0 = arith.constant 0 : index
    %c0_0 = arith.constant 0 : index
    %c0_1 = arith.constant 0 : index
    %0 = vector.load %arg2[%c0, %c0_0, %c0_1] : memref<1x128x128xbf16, #tpu.memory_space<vmem>>, vector<1x128x128xbf16>
    %1 = vector.shape_cast %0 : vector<1x128x128xbf16> to vector<128x128xbf16>
    %2 = arith.extf %1 : vector<128x128xbf16> to vector<128x128xf32>
    %c0_2 = arith.constant 0 : index
    %c0_3 = arith.constant 0 : index
    %3 = vector.load %arg7[%c0_2, %c0_3] : memref<128x256xf32, #tpu.memory_space<vmem>>, vector<128x128xf32>
    tpu.vector_store %arg7[%c0_2, %c0_3], %2 {strides = array<i32>} : memref<128x256xf32, #tpu.memory_space<vmem>>, vector<128x128xf32>,
    %c0_4 = arith.constant 0 : index
    %c0_5 = arith.constant 0 : index
    %c0_6 = arith.constant 0 : index
    %4 = vector.load %arg3[%c0_4, %c0_5, %c0_6] : memref<1x8x128xbf16, #tpu.memory_space<vmem>>, vector<1x8x128xbf16>
    %5 = vector.shape_cast %4 : vector<1x8x128xbf16> to vector<8x128xbf16>
    %6 = arith.extf %5 : vector<8x128xbf16> to vector<8x128xf32>
    %c1 = arith.constant 1 : index
    %c0_7 = arith.constant 0 : index
    %7 = vector.load %arg7[%c1, %c0_7] : memref<128x256xf32, #tpu.memory_space<vmem>>, vector<127x128xf32>
    %c0_8 = arith.constant 0 : index
    %c128 = arith.constant 128 : index
    %8 = vector.load %arg7[%c0_8, %c128] : memref<128x256xf32, #tpu.memory_space<vmem>>, vector<127x128xf32>
    tpu.vector_store %arg7[%c0_8, %c128], %7 {strides = array<i32>} : memref<128x256xf32, #tpu.memory_space<vmem>>, vector<127x128xf32>,
    %9 = vector.extract_strided_slice %6 {offsets = [0, 0], sizes = [1, 128], strides = [1, 1]} : vector<8x128xf32> to vector<1x128xf32>
    %c127 = arith.constant 127 : index
    %c128_9 = arith.constant 128 : index
    %10 = vector.load %arg7[%c127, %c128_9] : memref<128x256xf32, #tpu.memory_space<vmem>>, vector<1x128xf32>
    tpu.vector_store %arg7[%c127, %c128_9], %9 {strides = array<i32>} : memref<128x256xf32, #tpu.memory_space<vmem>>, vector<1x128xf32>,
    %c0_10 = arith.constant 0 : index
    %c0_11 = arith.constant 0 : index
    %11 = vector.load %arg7[%c0_10, %c0_11] : memref<128x256xf32, #tpu.memory_space<vmem>>, vector<128x256xf32>
    %12 = arith.truncf %11 : vector<128x256xf32> to vector<128x256xbf16>
    %c0_12 = arith.constant 0 : index
    %c0_13 = arith.constant 0 : index
    %13 = vector.load %arg4[%c0_12, %c0_13] : memref<256x512xbf16, #tpu.memory_space<vmem>>, vector<256x512xbf16>
    %cst = arith.constant dense<0.000000e+00> : vector<128x512xf32>
    %14 = tpu.matmul %12, %13, %cst {dimension_numbers = #tpu.dot_dimension_numbers<[1], [0], [0], [1], [0, 0, 1, 1], [], []>} : vector<128x256xbf16>, vector<256x512xbf16>, vector<128x512xf32> -> vector<128x512xf32>
    %15 = vector.extract_strided_slice %14 {offsets = [0, 0], sizes = [128, 256], strides = [1, 1]} : vector<128x512xf32> to vector<128x256xf32>
    %16 = tpu.transpose %15, [1, 0] : vector<128x256xf32> -> vector<256x128xf32>
    %17 = vector.extract_strided_slice %16 {offsets = [0, 0], sizes = [136, 128], strides = [1, 1]} : vector<256x128xf32> to vector<136x128xf32>
    %18 = vector.extract_strided_slice %14 {offsets = [0, 256], sizes = [128, 256], strides = [1, 1]} : vector<128x512xf32> to vector<128x256xf32>
    %19 = tpu.transpose %18, [1, 0] : vector<128x256xf32> -> vector<256x128xf32>
    %20 = vector.extract_strided_slice %19 {offsets = [0, 0], sizes = [136, 128], strides = [1, 1]} : vector<256x128xf32> to vector<136x128xf32>
    %21 = arith.mulf %17, %17 : vector<136x128xf32>
    %22 = arith.mulf %20, %20 : vector<136x128xf32>
    %23 = arith.addf %21, %22 : vector<136x128xf32>
    %24 = math.sqrt %23 : vector<136x128xf32>
    %c0_14 = arith.constant 0 : index
    %c0_15 = arith.constant 0 : index
    %c0_16 = arith.constant 0 : index
    %25 = vector.load %arg5[%c0_14, %c0_15, %c0_16] : memref<1x136x128xf32, #tpu.memory_space<vmem>>, vector<1x136x128xf32>
    %26 = vector.shape_cast %25 : vector<1x136x128xf32> to vector<136x128xf32>
    %27 = vector.shape_cast %24 : vector<136x128xf32> to vector<1x136x128xf32>
    tpu.vector_store %arg5[%c0_14, %c0_15, %c0_16], %27 {strides = array<i32>} : memref<1x136x128xf32, #tpu.memory_space<vmem>>, vector<1x136x128xf32>,
    %28 = math.absf %17 : vector<136x128xf32>
    %29 = math.absf %20 : vector<136x128xf32>
    %30 = arith.maximumf %28, %29 : vector<136x128xf32>
    %31 = arith.minimumf %28, %29 : vector<136x128xf32>
    %cst_17 = arith.constant 1.000000e-30 : f32
    %32 = vector.broadcast %cst_17 : f32 to vector<136x128xf32>
    %33 = arith.maximumf %30, %32 : vector<136x128xf32>
    %34 = tpu.reciprocal %33 {approx = true} : vector<136x128xf32> -> vector<136x128xf32>
    %35 = arith.mulf %31, %34 : vector<136x128xf32>
    %36 = arith.mulf %35, %35 : vector<136x128xf32>
    %cst_18 = arith.constant -0.0134804696 : f32
    %37 = vector.broadcast %cst_18 : f32 to vector<136x128xf32>
    %38 = arith.mulf %37, %36 : vector<136x128xf32>
    %cst_19 = arith.constant 0.057477314 : f32
    %39 = vector.broadcast %cst_19 : f32 to vector<136x128xf32>
    %40 = arith.addf %38, %39 : vector<136x128xf32>
    %41 = arith.mulf %40, %36 : vector<136x128xf32>
    %cst_20 = arith.constant 0.121239074 : f32
    %42 = vector.broadcast %cst_20 : f32 to vector<136x128xf32>
    %43 = arith.subf %41, %42 : vector<136x128xf32>
    %44 = arith.mulf %43, %36 : vector<136x128xf32>
    %cst_21 = arith.constant 0.19563593 : f32
    %45 = vector.broadcast %cst_21 : f32 to vector<136x128xf32>
    %46 = arith.addf %44, %45 : vector<136x128xf32>
    %47 = arith.mulf %46, %36 : vector<136x128xf32>
    %cst_22 = arith.constant 0.33299461 : f32
    %48 = vector.broadcast %cst_22 : f32 to vector<136x128xf32>
    %49 = arith.subf %47, %48 : vector<136x128xf32>
    %50 = arith.mulf %49, %36 : vector<136x128xf32>
    %cst_23 = arith.constant 0.999995648 : f32
    %51 = vector.broadcast %cst_23 : f32 to vector<136x128xf32>
    %52 = arith.addf %50, %51 : vector<136x128xf32>
    %53 = arith.mulf %52, %35 : vector<136x128xf32>
    %54 = arith.cmpf ogt, %29, %28 : vector<136x128xf32>
    %cst_24 = arith.constant 1.57079637 : f32
    %55 = vector.broadcast %cst_24 : f32 to vector<136x128xf32>
    %56 = arith.subf %55, %53 : vector<136x128xf32>
    %57 = arith.select %54, %56, %53 : vector<136x128xi1>, vector<136x128xf32>
    %cst_25 = arith.constant 0.000000e+00 : f32
    %58 = vector.broadcast %cst_25 : f32 to vector<136x128xf32>
    %59 = arith.cmpf olt, %17, %58 : vector<136x128xf32>
    %cst_26 = arith.constant 3.14159274 : f32
    %60 = vector.broadcast %cst_26 : f32 to vector<136x128xf32>
    %61 = arith.subf %60, %57 : vector<136x128xf32>
    %62 = arith.select %59, %61, %57 : vector<136x128xi1>, vector<136x128xf32>
    %cst_27 = arith.constant 0.000000e+00 : f32
    %63 = vector.broadcast %cst_27 : f32 to vector<136x128xf32>
    %64 = arith.cmpf olt, %20, %63 : vector<136x128xf32>
    %cst_28 = arith.constant 0.000000e+00 : f32
    %65 = vector.broadcast %cst_28 : f32 to vector<136x128xf32>
    %66 = arith.subf %65, %62 : vector<136x128xf32>
    %67 = arith.select %64, %66, %62 : vector<136x128xi1>, vector<136x128xf32>
    %c0_29 = arith.constant 0 : index
    %c0_30 = arith.constant 0 : index
    %c0_31 = arith.constant 0 : index
    %68 = vector.load %arg6[%c0_29, %c0_30, %c0_31] : memref<1x136x128xf32, #tpu.memory_space<vmem>>, vector<1x136x128xf32>
    %69 = vector.shape_cast %68 : vector<1x136x128xf32> to vector<136x128xf32>
    %70 = vector.shape_cast %67 : vector<136x128xf32> to vector<1x136x128xf32>
    tpu.vector_store %arg6[%c0_29, %c0_30, %c0_31], %70 {strides = array<i32>} : memref<1x136x128xf32, #tpu.memory_space<vmem>>, vector<1x136x128xf32>,
    return
  }
  func.func @transform_0(%arg0: i32, %arg1: i32) -> (i32, i32, i32) {
    %c0_i32 = arith.constant 0 : i32
    %c0_i32_0 = arith.constant 0 : i32
    return %arg1, %arg0, %c0_i32 : i32, i32, i32
  }
  func.func @transform_1(%arg0: i32, %arg1: i32) -> (i32, i32, i32) {
    %c1_i32 = arith.constant 1 : i32
    %0 = arith.addi %arg0, %c1_i32 : i32
    %c16_i32 = arith.constant 16 : i32
    %1 = arith.muli %0, %c16_i32 : i32
    %c0_i32 = arith.constant 0 : i32
    %c0_i32_0 = arith.constant 0 : i32
    return %arg1, %1, %c0_i32 : i32, i32, i32
  }
  func.func @transform_2(%arg0: i32, %arg1: i32) -> (i32, i32) {
    %c0_i32 = arith.constant 0 : i32
    %c0_i32_0 = arith.constant 0 : i32
    %c0_i32_1 = arith.constant 0 : i32
    return %c0_i32, %c0_i32_0 : i32, i32
  }
  func.func @transform_3(%arg0: i32, %arg1: i32) -> (i32, i32, i32) {
    %c0_i32 = arith.constant 0 : i32
    %c0_i32_0 = arith.constant 0 : i32
    return %arg1, %c0_i32, %arg0 : i32, i32, i32
  }
  func.func @transform_4(%arg0: i32, %arg1: i32) -> (i32, i32, i32) {
    %c0_i32 = arith.constant 0 : i32
    %c0_i32_0 = arith.constant 0 : i32
    return %arg1, %c0_i32, %arg0 : i32, i32, i32
  }
}

</mosaic_0001>

<bundles_post_ra>
// kernel: tpu_custom_call.1
= control target key start
LH: loop header
LB: loop body
LE: loop exit
PB: predicated region body
PF: predicated region fallthrough
CT: control target
= control target key end

     0   :  { %s3950_s0 = inlined_call_operand.hbm [shape: bf16[2,136,128], index: 0, kind: input, shape index: {}]   ;;  %s3951_s1 = inlined_call_operand.hbm [shape: bf16[2,136,128], index: 1, kind: input, shape index: {}]   ;;  %s3952_s2 = inlined_call_operand.hbm [shape: bf16[256,512], index: 2, kind: input, shape index: {}]   ;;  %s3953_s3 = inlined_call_operand.hbm [shape: f32[2,136,128], index: 3, kind: output, shape index: {0}]   ;;  %s3954_s4 = inlined_call_operand.hbm [shape: f32[2,136,128], index: 4, kind: output, shape index: {1}]  }
   0x1   :  { %3961 = sst [smem:[#allocation22_spill]] %s3950_s0 }
   0x2   :  { %3962 = sst [smem:[#allocation23_spill]] %s3952_s2 }
   0x3   :  { %10 = vsyncpa [#allocation4], 0 }
   0x4   :  { %12 = vsyncpa [#allocation4 + $0x1], 0 }
   0x5   :  { %13 = vsyncpa [#allocation7], 0 }
   0x6   :  { %15 = vsyncpa [#allocation7 + $0x1], 0 }
   0x7   :  { %16 = vsyncpa [#allocation5], 0 }
   0x8   :  { %18 = vsyncpa [#allocation5 + $0x1], 0 }
   0x9   :  { %19 = vsyncpa [#allocation11], 0 }
   0xa   :  { %21 = vsyncpa [#allocation11 + $0x1], 0  ;;  %s2785_s15 = smov 0   ;;  %s2787_s16 = smov 0  }
   0xb   :  { %s2789_s17 = smov 0   ;;  %s2791_s18 = smov 0  }
   0xc   :  { %s2793_s19 = smov 0   ;;  %s2795_s20 = smov 0  }
   0xd LB: > { %3963 = sst [smem:[#allocation17_spill]] %s2735_s17  ;;  %s2816_s21 = sadd.s32 4294967295, %s2747_s20   ;;  %s2747_s20 = sphi %s2795_s20, %s27_s20   ;;  %s2743_s19 = sphi %s2793_s19, %s3987_s19   ;;  %s2739_s18 = sphi %s2791_s18, %s3986_s18   ;;  %s2735_s17 = sphi %s2789_s17, %s3982_s17   ;;  %s2731_s16 = sphi %s2787_s16, %s3985_s16   ;;  %s2727_s15 = sphi %s2785_s15, %s3984_s15  }
   0xe   : > { %3964 = sst [smem:[#allocation18_spill]] %s2747_s20  ;;  %s2128_s22 = sadd.s32 4294967294, %s2747_s20  }
   0xf   : > { %p61_p0 = scmp.ne.s32.totalorder %s2731_s16, %s2727_s15  ;;  %p62_p1 = scmp.eq.s32.totalorder %s2816_s21, 0 }
  0x10   : > { %p146_p3 = scmp.eq.s32.totalorder %s2128_s22, 1  ;;  %p2129_p5 = scmp.ge.s32.totalorder %s2747_s20, 1 }
  0x11   : > { %p2825_p4 = por %p62_p1, %p61_p0  ;;  %p181_p7 = scmp.lt.s32.totalorder %s2747_s20, 3 }
  0x12   : > { %p2830_p6 = por %p146_p3, %p61_p0  ;;  %s2749_s26 = smov [#allocation8]  }
  0x13   : > { %p2835_p8 = pnand %p2129_p5, %p181_p7  ;;  %s193_s27 = sshll.u32 %s2749_s26, 4  ;;  %s194_s27 = int_to_ptr.vmem [resolvable:$true] %s193_s27 }
  0x14   : > { %s3966_s24 = scalar_select %p2830_p6, 1, 0 }
  0x15   : > { %p2297_p9 = pneg %p2835_p8  ;;  %p2131_p10 = scmp.ge.s32.totalorder %s2747_s20, 2 }
  0x16   : > { %3967 = sst [smem:[#allocation19_spill]] %s3966_s24  ;;  %s36_s29 = sadd.s32 1, %s2743_s19 }
  0x17   : > { %p2844_p11 = pnand %p2297_p9, %p62_p1  ;;  %s2557_s30 = scalar_lea.vmem %s194_s27, 8192 }
  0x18   : > { %p2558_p13 = scmp.ne.s32.totalorder %s194_s27, %s2557_s30  ;;  %p2565_p5 = scmp.lt.s32.totalorder %s194_s27, %s194_s27 }
  0x19   : > { %p2548_p12 = pneg %p2844_p11  ;;  %p2566_p7 = scmp.lt.s32.totalorder %s2557_s30, %s2557_s30 }
  0x1b   : > { %p2560_p0 = pnand %p2558_p13, %p2548_p12  ;;  %p2567_p2 = por %p2566_p7, %p2565_p5 }
  0x1d   : > { %p2561_p3 = pneg %p2560_p0 }
  0x1f   : > { %p2568_p6 = pnand %p2567_p2, %p2561_p3 }
  0x21   : > { %2571 = shalt.err (!%p2568_p6)
}
  0x22   : > { %s2750_s5 = smov 256   ;;  %s2751_s6 = smov 16  }
  0x23   : > { %s3970_s2 = sld [smem:[#allocation23_spill]]  ;;  %p37_p2 = scmp.ge.s32.totalorder %s36_s29, 2 }
  0x24   : > { %s48_s9 = sadd.s32 1, %s2735_s17  ;;  %p55_p6 = scmp.ne.s32.totalorder %s2735_s17, %s2731_s16 }
  0x25   : > { %p56_p9 = scmp.eq.s32.totalorder %s2747_s20, 0  ;;  %s3989_s29 = smov (%p37_p2, %s36_s29), 0 }
  0x26   : > { %3971 = sst [smem:[#allocation20_spill]] %s3989_s29  ;;  %p3972_p13 = scmp.eq.s32.totalorder %s2816_s21, 1 }
  0x27   : > { %p57_p12 = por %p56_p9, %p55_p6  ;;  %s43_s11 = ssub.s32 %s2743_s19, %s3989_s29 }
  0x28   : > { %p2864_p0 = por %p3972_p13, %p55_p6  ;;  %p2316_p3 = scmp.lt.s32.totalorder %s2747_s20, 2 }
  0x29   : > { %2300 = dma.hbm_to_vmem [thread:$0]  (!%p2844_p11), %s3970_s2, 8192, %s194_s27, [#allocation7], %s2750_s5, %s2750_s5, %s2751_s6  }
  0x2a   : > { %p46_p5 = scmp.eq.s32.totalorder %s43_s11, 0  ;;  %s2872_s12 = sand.u32 1, %s2735_s17  }
  0x2b   : > { %s2132_s13 = sshll.u32 %s2872_s12, 6  ;;  %s3955_s22 = smul.u32 1088, %s2743_s19 }
  0x2c   : > { %s2876_s14 = scalar_select %p46_p5, %s2735_s17, %s48_s9  }
  0x2d   : > { %s211_s26 = scalar_lea.vmem [#allocation3], %s2132_s13  ;;  %p2879_p11 = pnand %p2316_p3, %p57_p12 }
  0x2e   : > { %3974 = sst [smem:[#allocation21_spill]] %s2876_s14  ;;  %s226_s27 = sshll.u32 %s211_s26, 4  ;;  %s227_s27 = int_to_ptr.vmem [resolvable:$true] %s226_s27 }
  0x2f   : > { %s3976_s0 = sld [smem:[#allocation22_spill]]  ;;  %s236_s7 = sand.u32 1, %s2747_s20  }
  0x30   : > { %s208_s8 = scalar_lea.sflag [#allocation4], %s2872_s12  ;;  %p2574_p7 = pneg %p2879_p11 }
  0x31   : > { %s2585_s9 = scalar_lea.vmem %s227_s27, 1024  ;;  %s2752_s11 = smov [#allocation3]  }
  0x32   : > { %p2586_p2 = scmp.ne.s32.totalorder %s227_s27, %s2585_s9  ;;  %s2590_s13 = sshll.u32 %s2752_s11, 4  ;;  %s2591_s13 = int_to_ptr.vmem [resolvable:$false] %s2590_s13 }
  0x33   : > { %s2592_s26 = scalar_lea.vmem %s2591_s13, 2048  ;;  %p2593_p12 = scmp.lt.s32.totalorder %s227_s27, %s2591_s13 }
  0x34   : > { %p2588_p6 = pnand %p2586_p2, %p2574_p7  ;;  %p2594_p13 = scmp.lt.s32.totalorder %s2592_s26, %s2585_s9 }
  0x35   : > { %s224_s6 = scalar_lea.hbm %s3976_s0, %s3955_s22 }
  0x36   : > { %p2589_p9 = pneg %p2588_p6  ;;  %p2595_p3 = por %p2594_p13, %p2593_p12 }
  0x38   : > { %p2596_p5 = pnand %p2595_p3, %p2589_p9 }
  0x3a   : > { %2599 = shalt.err (!%p2596_p5)
}
  0x3b   : > { %s2753_s30 = smov 64   ;;  %s2754_s5 = smov 4  }
  0x3c   : > { %2304 = dma.hbm_to_vmem [thread:$0]  (!%p2879_p11), %s224_s6, 1024, %s227_s27, %s208_s8, %s2753_s30, %s2753_s30, %s2754_s5  }
  0x3d   : > { %s2134_s22 = sshll.u32 %s2872_s12, 2  ;;  %s3977_s0 = smul.u32 1088, %s2743_s19 }
  0x3e   : > { %s240_s13 = scalar_lea.vmem [#allocation6], %s2134_s22  ;;  %s237_s26 = scalar_lea.sflag [#allocation7], %s236_s7 }
  0x3f   : > { %s2028_s11 = scalar_lea.hbm %s3951_s1, %s3977_s0  ;;  %s251_s9 = sshll.u32 %s240_s13, 4  ;;  %s252_s9 = int_to_ptr.vmem [resolvable:$true] %s251_s9 }
  0x40   : > { %s2029_s14 = scalar_lea.hbm %s2028_s11, 1024  ;;  %s2613_s17 = scalar_lea.vmem %s252_s9, 64 }
  0x41   : > { %p2614_p2 = scmp.ne.s32.totalorder %s252_s9, %s2613_s17  ;;  %s2755_s20 = smov [#allocation6]  }
  0x42   : > { %s2618_s24 = sshll.u32 %s2755_s20, 4  ;;  %s2619_s24 = int_to_ptr.vmem [resolvable:$false] %s2618_s24 }
  0x43   : > { %p2616_p6 = pnand %p2614_p2, %p2574_p7  ;;  %s2620_s12 = scalar_lea.vmem %s2619_s24, 128 }
  0x44   : > { %p2621_p12 = scmp.lt.s32.totalorder %s252_s9, %s2619_s24  ;;  %p2622_p13 = scmp.lt.s32.totalorder %s2620_s12, %s2613_s17 }
  0x45   : > { %p2617_p9 = pneg %p2616_p6 }
  0x46   : > { %p2623_p3 = por %p2622_p13, %p2621_p12 }
  0x48   : > { %p2624_p5 = pnand %p2623_p3, %p2617_p9 }
  0x4a   : > { %2627 = shalt.err (!%p2624_p5)
}
  0x4b   : > { %2307 = dma.hbm_to_vmem [thread:$0]  (!%p2879_p11), %s2029_s14, 64, %s252_s9, %s237_s26  }
  0x4c   : > { %260 = sbr.rel (%p2835_p8) target bundleno = 687 (0x2af), region = 32  ;;  %s2911_s0 = sand.u32 (!%p2835_p8), 1, %s2731_s16  }
  0x4d   : > { %s2137_s2 = sshll.u32 (!%p2835_p8), %s2911_s0, 6  ;;  %s263_s20 = scalar_lea.sflag (!%p2835_p8), [#allocation4], %s2911_s0 }
  0x4e   : > { %s2915_s29 = scalar_lea.vmem (!%p2835_p8), [#allocation3], %s2137_s2 }
  0x51   : > { %2706 = dma.done.wait (%p2825_p4), %s263_s20, 1024  }
  0x52   : > { %2708 = vsyncadd (%p2825_p4), %s263_s20, 4294966272  ;;  %s271_s17 = sand.u32 1, %s2816_s21   ;;  %s2138_s24 = sshll.u32 %s2911_s0, 2 }
  0x53   : > { %s272_s25 = scalar_lea.sflag [#allocation7], %s271_s17  ;;  %s2923_s14 = scalar_lea.vmem [#allocation6], %s2138_s24 }
  0x54   : > { %2710 = dma.done.wait (%p2825_p4), %s272_s25, 64  }
  0x55   : > { %2712 = vsyncadd (%p2825_p4), %s272_s25, 4294967232 }
  0x56   : > { %2714 = dma.done.wait (%p62_p1), [#allocation7], 8192  }
  0x57   : > { %2716 = vsyncadd (%p62_p1), [#allocation7], 4294959104  ;;  %v2374_v0 = vld [vmem:[#allocation8 + $0xe4] ss:$16 sps:$4 sm:$0xff]   ;;  %v2376_v1 = vld [vmem:[#allocation8 + $0xec] ss:$16 sps:$4 sm:$0xff]  }
  0x58   : > { %900 = vmatprep.subr.bf16.mxu0 %v2374_v0  ;;  %v2378_v2 = vld [vmem:[#allocation8 + $0xe0] ss:$16 sps:$4 sm:$0xff]   ;;  %v2379_v3 = vld [vmem:[#allocation8 + $0xe8] ss:$16 sps:$4 sm:$0xff]   ;;  %1013 = vmatprep.subr.bf16.mxu1 %v2376_v1  ;;  %v2380_v4 = vld [vmem:[#allocation8 + $0xc4] ss:$16 sps:$4 sm:$0xff]  }
  0x59   : > { %901 = vmatpush1.bf16.msra.mxu0 %v2378_v2  ;;  %1014 = vmatpush1.bf16.msra.mxu1 %v2379_v3  ;;  %v2382_v5 = vld [vmem:[#allocation8 + $0xcc] ss:$16 sps:$4 sm:$0xff]   ;;  %v2384_v6 = vld [vmem:[#allocation8 + $0xc0] ss:$16 sps:$4 sm:$0xff]   ;;  %v2385_v7 = vld [vmem:[#allocation8 + $0xc8] ss:$16 sps:$4 sm:$0xff]  }
  0x5a   : > { %902 = vmatprep.subr.bf16.mxu0 %v2380_v4  ;;  %1015 = vmatprep.subr.bf16.mxu1 %v2382_v5  ;;  %v2386_v8 = vld [vmem:[#allocation8 + $0xa4] ss:$16 sps:$4 sm:$0xff]   ;;  %v2388_v9 = vld [vmem:[#allocation8 + $0xac] ss:$16 sps:$4 sm:$0xff]   ;;  %v2390_v10 = vld [vmem:[#allocation8 + $0xa0] ss:$16 sps:$4 sm:$0xff]  }
  0x5b   : > { %v2391_v11 = vld [vmem:[#allocation8 + $0xa8] ss:$16 sps:$4 sm:$0xff]   ;;  %v2392_v12 = vld [vmem:[#allocation8 + $0x84] ss:$16 sps:$4 sm:$0xff]   ;;  %v2394_v13 = vld [vmem:[#allocation8 + $0x8c] ss:$16 sps:$4 sm:$0xff]  }
  0x5c   : > { %v2396_v14 = vld [vmem:[#allocation8 + $0x80] ss:$16 sps:$4 sm:$0xff]   ;;  %v2397_v15 = vld [vmem:[#allocation8 + $0x88] ss:$16 sps:$4 sm:$0xff]   ;;  %v2398_v16 = vld [vmem:[#allocation8 + $0x64] ss:$16 sps:$4 sm:$0xff]  }
  0x5d   : > { %903 = vmatpush1.bf16.msra.mxu0 %v2384_v6  ;;  %1016 = vmatpush1.bf16.msra.mxu1 %v2385_v7  ;;  %v2400_v17 = vld [vmem:[#allocation8 + $0x6c] ss:$16 sps:$4 sm:$0xff]   ;;  %v2402_v18 = vld [vmem:[#allocation8 + $0x60] ss:$16 sps:$4 sm:$0xff]   ;;  %v2403_v19 = vld [vmem:[#allocation8 + $0x68] ss:$16 sps:$4 sm:$0xff]  }
  0x5e   : > { %904 = vmatprep.subr.bf16.mxu0 %v2386_v8  ;;  %1017 = vmatprep.subr.bf16.mxu1 %v2388_v9  ;;  %v2404_v20 = vld [vmem:[#allocation8 + $0x44] ss:$16 sps:$4 sm:$0xff]   ;;  %v2406_v21 = vld [vmem:[#allocation8 + $0x4c] ss:$16 sps:$4 sm:$0xff]   ;;  %v2408_v22 = vld [vmem:[#allocation8 + $0x40] ss:$16 sps:$4 sm:$0xff]  }
  0x5f   : > { %v2409_v23 = vld [vmem:[#allocation8 + $0x48] ss:$16 sps:$4 sm:$0xff]   ;;  %v2410_v24 = vld [vmem:[#allocation8 + $0x24] ss:$16 sps:$4 sm:$0xff]   ;;  %v2412_v25 = vld [vmem:[#allocation8 + $0x2c] ss:$16 sps:$4 sm:$0xff]  }
  0x60   : > { %v2414_v26 = vld [vmem:[#allocation8 + $0x20] ss:$16 sps:$4 sm:$0xff]   ;;  %v2415_v27 = vld [vmem:[#allocation8 + $0x28] ss:$16 sps:$4 sm:$0xff]   ;;  %v2416_v28 = vld [vmem:[#allocation8 + $0x4] ss:$16 sps:$4 sm:$0xff]  }
  0x61   : > { %905 = vmatpush1.bf16.msra.mxu0 %v2390_v10  ;;  %1018 = vmatpush1.bf16.msra.mxu1 %v2391_v11  ;;  %v2418_v29 = vld [vmem:[#allocation8 + $0xc] ss:$16 sps:$4 sm:$0xff]   ;;  %v2420_v30 = vld [vmem:[#allocation8] ss:$16 sps:$4 sm:$0xff]   ;;  %v2421_v31 = vld [vmem:[#allocation8 + $0x8] ss:$16 sps:$4 sm:$0xff]  }
  0x62   : > { %906 = vmatprep.subr.bf16.mxu0 %v2392_v12  ;;  %1019 = vmatprep.subr.bf16.mxu1 %v2394_v13  ;;  %v2422_v32 = vld [vmem:[#allocation8 + $0x1e4] ss:$16 sps:$4 sm:$0xff]   ;;  %v2424_v33 = vld [vmem:[#allocation8 + $0x1ec] ss:$16 sps:$4 sm:$0xff]   ;;  %v2426_v34 = vld [vmem:[#allocation8 + $0x1e0] ss:$16 sps:$4 sm:$0xff]  }
  0x63   : > { %v2427_v35 = vld [vmem:[#allocation8 + $0x1e8] ss:$16 sps:$4 sm:$0xff]   ;;  %v2428_v36 = vld [vmem:[#allocation8 + $0x1c4] ss:$16 sps:$4 sm:$0xff]   ;;  %v2430_v37 = vld [vmem:[#allocation8 + $0x1cc] ss:$16 sps:$4 sm:$0xff]  }
  0x64   : > { %v2432_v38 = vld [vmem:[#allocation8 + $0x1c0] ss:$16 sps:$4 sm:$0xff]   ;;  %v2433_v39 = vld [vmem:[#allocation8 + $0x1c8] ss:$16 sps:$4 sm:$0xff]   ;;  %v2434_v40 = vld [vmem:[#allocation8 + $0x1a4] ss:$16 sps:$4 sm:$0xff]  }
  0x65   : > { %907 = vmatpush1.bf16.msra.mxu0 %v2396_v14  ;;  %1020 = vmatpush1.bf16.msra.mxu1 %v2397_v15  ;;  %v2436_v41 = vld [vmem:[#allocation8 + $0x1ac] ss:$16 sps:$4 sm:$0xff]   ;;  %v2438_v42 = vld [vmem:[#allocation8 + $0x1a0] ss:$16 sps:$4 sm:$0xff]   ;;  %v2439_v43 = vld [vmem:[#allocation8 + $0x1a8] ss:$16 sps:$4 sm:$0xff]  }
  0x66   : > { %908 = vmatprep.subr.bf16.mxu0 %v2398_v16  ;;  %1021 = vmatprep.subr.bf16.mxu1 %v2400_v17  ;;  %v2440_v44 = vld [vmem:[#allocation8 + $0x184] ss:$16 sps:$4 sm:$0xff]   ;;  %v2442_v45 = vld [vmem:[#allocation8 + $0x18c] ss:$16 sps:$4 sm:$0xff]   ;;  %v2444_v47 = vld [vmem:[#allocation8 + $0x180] ss:$16 sps:$4 sm:$0xff]  }
  0x67   : > { %v2243_v46 = vld [vmem:[%s2915_s29] sm:$0xff]   ;;  %v2274_v50 = vld [vmem:[%s2915_s29 + $0x8] sm:$0xff]   ;;  %v2275_v51 = vld [vmem:[%s2915_s29 + $0x10] sm:$0xff]   ;;  %vm403_vm0 = vcmask 1046528   ;;  %s2282_s21 = smul.u32 136, %s2911_s0  ;;  %s1935_s30 = scalar_lea.sflag [#allocation5], %s2911_s0 }
  0x68   : > { %v2244_v48 = vunpack.c.l.bf16 %v2243_v46  ;;  %v2245_v49 = vunpack.c.h.bf16 %v2243_v46  ;;  %v2445_v52 = vld [vmem:[#allocation8 + $0x188] ss:$16 sps:$4 sm:$0xff]   ;;  %v2446_v53 = vld [vmem:[#allocation8 + $0x164] ss:$16 sps:$4 sm:$0xff]   ;;  %v2248_v54 = vunpack.c.l.bf16 %v2274_v50  ;;  %v2249_v55 = vunpack.c.h.bf16 %v2274_v50  ;;  %v2448_v59 = vld [vmem:[#allocation8 + $0x16c] ss:$16 sps:$4 sm:$0xff]  }
  0x69   : > { %909 = vmatpush1.bf16.msra.mxu0 %v2402_v18  ;;  %1022 = vmatpush1.bf16.msra.mxu1 %v2403_v19  ;;  %v2252_v56 = vunpack.c.l.bf16 %v2275_v51  ;;  %v2253_v57 = vunpack.c.h.bf16 %v2275_v51  ;;  %v2276_v58 = vld [vmem:[%s2915_s29 + $0x18] sm:$0xff]   ;;  %v2277_v63 = vld [vmem:[%s2915_s29 + $0x20] sm:$0xff]   ;;  %v2278_v0 = vld [vmem:[%s2915_s29 + $0x28] sm:$0xff]   ;;  %s3130_s23 = scalar_lea.vmem [#allocation9], %s2282_s21  ;;  %s3341_s22 = scalar_lea.vmem [#allocation10], %s2282_s21 }
  0x6a   : > { %910 = vmatprep.subr.bf16.mxu0 %v2404_v20  ;;  %1023 = vmatprep.subr.bf16.mxu1 %v2406_v21  ;;  %353 = vst [vmem:[#allocation2] sm:$0xff] %v2244_v48  ;;  %v405_v60 = vrot.slane %v2245_v49, 1  ;;  %v2256_v61 = vunpack.c.l.bf16 %v2276_v58  ;;  %v2257_v62 = vunpack.c.h.bf16 %v2276_v58  ;;  %v407_v1 = vrot.slane %v2248_v54, 1  ;;  %v2450_v9 = vld [vmem:[#allocation8 + $0x160] ss:$16 sps:$4 sm:$0xff]   ;;  %v2279_v15 = vld [vmem:[%s2915_s29 + $0x30] sm:$0xff]  }
  0x6b   : > { %v409_v2 = vrot.slane %v2249_v55, 1  ;;  %v411_v3 = vrot.slane %v2252_v56, 1  ;;  %v413_v4 = vrot.slane %v2253_v57, 1  ;;  %v2260_v6 = vunpack.c.l.bf16 %v2277_v63  ;;  %v2451_v10 = vld [vmem:[#allocation8 + $0x168] ss:$16 sps:$4 sm:$0xff]   ;;  %v2280_v21 = vld [vmem:[%s2915_s29 + $0x38] sm:$0xff]  }
  0x6c   : > { %v415_v5 = vrot.slane %v2256_v61, 1  ;;  %v417_v7 = vrot.slane %v2257_v62, 1  ;;  %v2261_v8 = vunpack.c.h.bf16 %v2277_v63  ;;  %v408_v11 = vsel %vm403_vm0, %v405_v60, %v407_v1  ;;  %v2452_v16 = vld [vmem:[#allocation8 + $0x144] ss:$16 sps:$4 sm:$0xff]   ;;  %v2454_v17 = vld [vmem:[#allocation8 + $0x14c] ss:$16 sps:$4 sm:$0xff]  }
  0x6d   : > { %911 = vmatpush1.bf16.msra.mxu0 %v2408_v22  ;;  %1024 = vmatpush1.bf16.msra.mxu1 %v2409_v23  ;;  %v2941_v12 = vsel %vm403_vm0, %v407_v1, %v409_v2  ;;  %v2944_v13 = vsel %vm403_vm0, %v409_v2, %v411_v3  ;;  %v2264_v14 = vunpack.c.l.bf16 %v2278_v0  ;;  %v2948_v18 = vsel %vm403_vm0, %v411_v3, %v413_v4  ;;  %v2462_v48 = vld [vmem:[#allocation8 + $0x120] ss:$16 sps:$4 sm:$0xff]   ;;  %v2463_v49 = vld [vmem:[#allocation8 + $0x128] ss:$16 sps:$4 sm:$0xff]   ;;  %v2466_v54 = vld [vmem:[#allocation8 + $0x10c] ss:$16 sps:$4 sm:$0xff]  }
  0x6e   : > { %912 = vmatprep.subr.bf16.mxu0 %v2410_v24  ;;  %1025 = vmatprep.subr.bf16.mxu1 %v2412_v25  ;;  %v2951_v19 = vsel %vm403_vm0, %v413_v4, %v415_v5  ;;  %v419_v20 = vrot.slane %v2260_v6, 1  ;;  %v2955_v22 = vsel %vm403_vm0, %v415_v5, %v417_v7  ;;  %v421_v23 = vrot.slane %v2261_v8, 1  ;;  %v2456_v25 = vld [vmem:[#allocation8 + $0x140] ss:$16 sps:$4 sm:$0xff]   ;;  %v2469_v58 = vld [vmem:[#allocation8 + $0x108] ss:$16 sps:$4 sm:$0xff]  }
  0x6f   : > { %v423_v24 = vrot.slane %v2264_v14, 1  ;;  %v2468_v57 = vld [vmem:[#allocation8 + $0x100] ss:$16 sps:$4 sm:$0xff]   ;;  %v505_v62 = vpack.c.bf16 %v2951_v19, %v2948_v18  ;;  %v2472_v63 = vld [vmem:[%s2915_s29 + $0x10] sm:$0xff]  ;;  %v2474_v3 = vld [vmem:[%s2915_s29 + $0x20] sm:$0xff]  ;;  %s2283_s27 = smul.u32 2176, %s2739_s18 }
  0x70   : > { %v2471_v61 = vld [vmem:[%s2915_s29 + $0x8] sm:$0xff]  ;;  %v2473_v1 = vld [vmem:[%s2915_s29 + $0x18] sm:$0xff]  ;;  %v2476_v8 = vld [vmem:[%s2915_s29 + $0x30] sm:$0xff]  ;;  %s1954_s28 = sshll.u32 %s3130_s23, 4  ;;  %s2756_s11 = smov [#allocation9]   ;;  %s3836_s28 = int_to_ptr.vmem [resolvable:$true] %s1954_s28 }
  0x71   : > { %913 = vmatpush1.bf16.msra.mxu0 %v2414_v26  ;;  %1026 = vmatpush1.bf16.msra.mxu1 %v2415_v27  ;;  %v2958_v26 = vsel %vm403_vm0, %v417_v7, %v419_v20  ;;  %v2265_v27 = vunpack.c.h.bf16 %v2278_v0  ;;  %v2475_v5 = vld [vmem:[%s2915_s29 + $0x28] sm:$0xff]  ;;  %s3830_s8 = scalar_lea.hbm %s3953_s3, %s2283_s27  ;;  %s2629_s5 = scalar_lea.vmem %s3836_s28, 2176 }
  0x72   : > { %914 = vmatprep.subr.bf16.mxu0 %v2416_v28  ;;  %1027 = vmatprep.subr.bf16.mxu1 %v2418_v29  ;;  %v2268_v28 = vunpack.c.l.bf16 %v2279_v15  ;;  %v2269_v29 = vunpack.c.h.bf16 %v2279_v15  ;;  %v507_v0 = vpack.c.bf16 %v2958_v26, %v2955_v22  ;;  %p2630_p1 = scmp.ne.s32.totalorder %s3836_s28, %s2629_s5  ;;  %s2633_s13 = sshll.u32 %s2756_s11, 4  ;;  %s2634_s13 = int_to_ptr.vmem [resolvable:$false] %s2633_s13 }
  0x73   : > { %s2635_s9 = scalar_lea.vmem %s2634_s13, 4352  ;;  %p2636_p11 = scmp.lt.s32.totalorder %s3836_s28, %s2634_s13 }
  0x74   : > { %p2631_p4 = pnand %p2630_p1, %p2864_p0  ;;  %p2637_p7 = scmp.lt.s32.totalorder %s2635_s9, %s2629_s5 }
  0x75   : > { %915 = vmatpush1.bf16.msra.mxu0 %v2420_v30  ;;  %1028 = vmatpush1.bf16.msra.mxu1 %v2421_v31  ;;  %v369_v30 = vld [vmem:[%s2923_s14] sm:$0xf] }
  0x76   : > { %916 = vmatprep.subr.bf16.mxu0 %v2422_v32  ;;  %1029 = vmatprep.subr.bf16.mxu1 %v2424_v33  ;;  %v2457_v31 = vld [vmem:[#allocation8 + $0x148] ss:$16 sps:$4 sm:$0xff]   ;;  %v2458_v32 = vld [vmem:[#allocation8 + $0x124] ss:$16 sps:$4 sm:$0xff]   ;;  %p2632_p8 = pneg %p2631_p4  ;;  %p2638_p2 = por %p2637_p7, %p2636_p11 }
  0x77   : > { %v371_v33 = vld [vmem:[#allocation2] sm:$0xfe] }
  0x78   : > { %p2639_p6 = pnand %p2638_p2, %p2632_p8 }
  0x79   : > { %917 = vmatpush2.bf16.msra.mxu0 %v2426_v34  ;;  %1030 = vmatpush2.bf16.msra.mxu1 %v2427_v35  ;;  %v422_v34 = vsel %vm403_vm0, %v419_v20, %v421_v23  ;;  %v424_v35 = vsel %vm403_vm0, %v421_v23, %v423_v24 }
  0x7a   : > { %918 = vmatprep.subr.bf16.mxu0 %v2428_v36  ;;  %1031 = vmatprep.subr.bf16.mxu1 %v2430_v37  ;;  %v2272_v36 = vunpack.c.l.bf16 %v2280_v21  ;;  %v2460_v37 = vld [vmem:[#allocation8 + $0x12c] ss:$16 sps:$4 sm:$0xff]   ;;  %v509_v2 = vpack.c.bf16 %v424_v35, %v422_v34 }
  0x7d   : > { %919 = vmatpush2.bf16.msra.mxu0 %v2432_v38  ;;  %1032 = vmatpush2.bf16.msra.mxu1 %v2433_v39  ;;  %v404_v38 = vrot.slane %v371_v33, 1  ;;  %v425_v39 = vrot.slane %v2265_v27, 1 }
  0x7e   : > { %920 = vmatprep.subr.bf16.mxu0 %v2434_v40  ;;  %1033 = vmatprep.subr.bf16.mxu1 %v2436_v41  ;;  %v427_v40 = vrot.slane %v2268_v28, 1  ;;  %v429_v41 = vrot.slane %v2269_v29, 1 }
  0x7f   : > { %v426_v46 = vsel %vm403_vm0, %v423_v24, %v425_v39 }
  0x80   : > { %v430_v51 = vsel %vm403_vm0, %v427_v40, %v429_v41 }
  0x81   : > { %921 = vmatpush2.bf16.msra.mxu0 %v2438_v42  ;;  %1034 = vmatpush2.bf16.msra.mxu1 %v2439_v43  ;;  %v431_v42 = vrot.slane %v2272_v36, 1  ;;  %v2273_v43 = vunpack.c.h.bf16 %v2280_v21 }
  0x82   : > { %922 = vmatprep.subr.bf16.mxu0 %v2440_v44  ;;  %1035 = vmatprep.subr.bf16.mxu1 %v2442_v45  ;;  %v370_v44 = vunpack.c.l.bf16 %v369_v30  ;;  %v406_v45 = vsel %vm403_vm0, %v404_v38, %v405_v60  ;;  %v503_v60 = vpack.c.bf16 %v2944_v13, %v2941_v12 }
  0x83   : > { %v501_v50 = vpack.c.bf16 %v408_v11, %v406_v45  ;;  %v432_v55 = vsel %vm403_vm0, %v429_v41, %v431_v42 }
  0x84   : > { %467 = vst [vmem:[#allocation2 + $0xff] sm:$0x1] %v370_v44  ;;  %v513_v6 = vpack.c.bf16 %v432_v55, %v430_v51 }
  0x85   : > { %923 = vmatpush2.bf16.msra.mxu0 %v2444_v47  ;;  %1036 = vmatpush2.bf16.msra.mxu1 %v2445_v52  ;;  %v428_v47 = vsel %vm403_vm0, %v425_v39, %v427_v40  ;;  %v433_v52 = vrot.slane %v2273_v43, 1 }
  0x86   : > { %924 = vmatprep.subr.bf16.mxu0 %v2446_v53  ;;  %1037 = vmatprep.subr.bf16.mxu1 %v2448_v59  ;;  %v2464_v53 = vld [vmem:[#allocation8 + $0x104] ss:$16 sps:$4 sm:$0xff]   ;;  %v2470_v59 = vld [vmem:[%s2915_s29] sm:$0xff]  ;;  %v511_v4 = vpack.c.bf16 %v428_v47, %v426_v46 }
  0x87   : > { %932 = vmatprep.mubr.bf16.mxu0 %v501_v50  ;;  %1045 = vmatprep.mubr.bf16.mxu1 %v501_v50  ;;  %v434_v56 = vsel %vm403_vm0, %v431_v42, %v433_v52  ;;  %466 = vst [vmem:[#allocation2 + $0xf8] sm:$0x7f] %v433_v52 }
  0x89   : > { %925 = vmatpush2.bf16.msra.mxu0 %v2450_v9  ;;  %1038 = vmatpush2.bf16.msra.mxu1 %v2451_v10  ;;  %v2477_v10 = vld [vmem:[%s2915_s29 + $0x38] sm:$0xff] }
  0x8a   : > { %926 = vmatprep.subr.bf16.mxu0 %v2452_v16  ;;  %1039 = vmatprep.subr.bf16.mxu1 %v2454_v17 }
  0x8d   : > { %927 = vmatpush2.bf16.msra.mxu0 %v2456_v25  ;;  %1040 = vmatpush2.bf16.msra.mxu1 %v2457_v31 }
  0x8e   : > { %928 = vmatprep.subr.bf16.mxu0 %v2458_v32  ;;  %1041 = vmatprep.subr.bf16.mxu1 %v2460_v37  ;;  %v499_v7 = vld [vmem:[#allocation2 + $0xf8] sm:$0xff] }
  0x8f   : > { %v515_v9 = vpack.c.bf16 %v499_v7, %v434_v56 }
  0x91   : > { %929 = vmatpush2.bf16.msra.mxu0 %v2462_v48  ;;  %1042 = vmatpush2.bf16.msra.mxu1 %v2463_v49 }
  0x92   : > { %930 = vmatprep.subr.bf16.mxu0 %v2464_v53  ;;  %1043 = vmatprep.subr.bf16.mxu1 %v2466_v54 }
  0x95   : > { %931 = vmatpush2.bf16.msra.mxu0 %v2468_v57  ;;  %1044 = vmatpush2.bf16.msra.mxu1 %v2469_v58 }
  0x98   : > { %933 = vmatmul.mubr.bf16.vlgmr.msra.gmra.mxu0 %v2470_v59  ;;  %1046 = vmatmul.mubr.bf16.vlgmr.msra.gmra.mxu1 %v2470_v59 }
  0x99   : > { %942 = vmatprep.mubr.bf16.mxu0 %v503_v60  ;;  %1055 = vmatprep.mubr.bf16.mxu1 %v503_v60 }
  0xa0   : > { %943 = vmatmul.mubr.bf16.gmra.mxu0 %v2471_v61  ;;  %1056 = vmatmul.mubr.bf16.gmra.mxu1 %v2471_v61 }
  0xa1   : > { %952 = vmatprep.mubr.bf16.mxu0 %v505_v62  ;;  %1065 = vmatprep.mubr.bf16.mxu1 %v505_v62 }
  0xa8   : > { %953 = vmatmul.mubr.bf16.gmra.mxu0 %v2472_v63  ;;  %1066 = vmatmul.mubr.bf16.gmra.mxu1 %v2472_v63 }
  0xa9   : > { %962 = vmatprep.mubr.bf16.mxu0 %v507_v0  ;;  %1075 = vmatprep.mubr.bf16.mxu1 %v507_v0 }
  0xb0   : > { %963 = vmatmul.mubr.bf16.gmra.mxu0 %v2473_v1  ;;  %1076 = vmatmul.mubr.bf16.gmra.mxu1 %v2473_v1 }
  0xb1   : > { %972 = vmatprep.mubr.bf16.mxu0 %v509_v2  ;;  %1085 = vmatprep.mubr.bf16.mxu1 %v509_v2 }
  0xb8   : > { %973 = vmatmul.mubr.bf16.gmra.mxu0 %v2474_v3  ;;  %1086 = vmatmul.mubr.bf16.gmra.mxu1 %v2474_v3 }
  0xb9   : > { %982 = vmatprep.mubr.bf16.mxu0 %v511_v4  ;;  %1095 = vmatprep.mubr.bf16.mxu1 %v511_v4 }
  0xc0   : > { %983 = vmatmul.mubr.bf16.gmra.mxu0 %v2475_v5  ;;  %1096 = vmatmul.mubr.bf16.gmra.mxu1 %v2475_v5 }
  0xc1   : > { %992 = vmatprep.mubr.bf16.mxu0 %v513_v6  ;;  %1105 = vmatprep.mubr.bf16.mxu1 %v513_v6 }
  0xc8   : > { %993 = vmatmul.mubr.bf16.gmra.mxu0 %v2476_v8  ;;  %1106 = vmatmul.mubr.bf16.gmra.mxu1 %v2476_v8 }
  0xc9   : > { %1002 = vmatprep.mubr.bf16.mxu0 %v515_v9  ;;  %1115 = vmatprep.mubr.bf16.mxu1 %v515_v9 }
  0xd0   : > { %1003 = vmatmul.mubr.bf16.gmra.mxu0 %v2477_v10  ;;  %1116 = vmatmul.mubr.bf16.gmra.mxu1 %v2477_v10 }
 0x158   : > { %v934_v11 = vpop.f32.mrf.mxu0  ;;  %v1047_v12 = vpop.f32.mrf.mxu1 }
 0x159   : > { %1190 = vxpose.xlu1.b32.start [1/16] %v1047_v12, 128  ;;  %1126 = vxpose.xlu0.b32.start [1/16] %v934_v11, 128 }
 0x15a   : > { %v2983_v13 = vpop.f32.mrf.mxu0  ;;  %v2985_v14 = vpop.f32.mrf.mxu1 }
 0x15c   : > { %v938_v15 = vpop.f32.mrf.mxu0  ;;  %v1051_v16 = vpop.f32.mrf.mxu1 }
 0x15d   : > { %1191 = vxpose.xlu1.b32.cont [2/16] %v1051_v16, 128  ;;  %1127 = vxpose.xlu0.b32.cont [2/16] %v938_v15, 128 }
 0x15e   : > { %v2987_v17 = vpop.f32.mrf.mxu0  ;;  %v2989_v18 = vpop.f32.mrf.mxu1 }
 0x160   : > { %v944_v19 = vpop.f32.mrf.mxu0  ;;  %v1057_v20 = vpop.f32.mrf.mxu1 }
 0x161   : > { %1192 = vxpose.xlu1.b32.cont [3/16] %v1057_v20, 128  ;;  %1128 = vxpose.xlu0.b32.cont [3/16] %v944_v19, 128 }
 0x162   : > { %v2991_v21 = vpop.f32.mrf.mxu0  ;;  %v2993_v22 = vpop.f32.mrf.mxu1 }
 0x164   : > { %v948_v23 = vpop.f32.mrf.mxu0  ;;  %v1061_v24 = vpop.f32.mrf.mxu1 }
 0x165   : > { %1193 = vxpose.xlu1.b32.cont [4/16] %v1061_v24, 128  ;;  %1129 = vxpose.xlu0.b32.cont [4/16] %v948_v23, 128 }
 0x166   : > { %v2995_v25 = vpop.f32.mrf.mxu0  ;;  %v2997_v26 = vpop.f32.mrf.mxu1 }
 0x168   : > { %v954_v27 = vpop.f32.mrf.mxu0  ;;  %v1067_v28 = vpop.f32.mrf.mxu1 }
 0x169   : > { %1194 = vxpose.xlu1.b32.cont [5/16] %v1067_v28, 128  ;;  %1130 = vxpose.xlu0.b32.cont [5/16] %v954_v27, 128 }
 0x16a   : > { %v2999_v29 = vpop.f32.mrf.mxu0  ;;  %v3001_v30 = vpop.f32.mrf.mxu1 }
 0x16c   : > { %v958_v31 = vpop.f32.mrf.mxu0  ;;  %v1071_v32 = vpop.f32.mrf.mxu1 }
 0x16d   : > { %1195 = vxpose.xlu1.b32.cont [6/16] %v1071_v32, 128  ;;  %1131 = vxpose.xlu0.b32.cont [6/16] %v958_v31, 128 }
 0x16e   : > { %v3003_v33 = vpop.f32.mrf.mxu0  ;;  %v3005_v34 = vpop.f32.mrf.mxu1 }
 0x170   : > { %v964_v35 = vpop.f32.mrf.mxu0  ;;  %v1077_v36 = vpop.f32.mrf.mxu1 }
 0x171   : > { %1196 = vxpose.xlu1.b32.cont [7/16] %v1077_v36, 128  ;;  %1132 = vxpose.xlu0.b32.cont [7/16] %v964_v35, 128 }
 0x172   : > { %v3007_v37 = vpop.f32.mrf.mxu0  ;;  %v3009_v38 = vpop.f32.mrf.mxu1 }
 0x174   : > { %v968_v39 = vpop.f32.mrf.mxu0  ;;  %v1081_v40 = vpop.f32.mrf.mxu1 }
 0x175   : > { %1197 = vxpose.xlu1.b32.cont [8/16] %v1081_v40, 128  ;;  %1133 = vxpose.xlu0.b32.cont [8/16] %v968_v39, 128 }
 0x176   : > { %v970_v41 = vpop.f32.mrf.mxu0  ;;  %v1083_v42 = vpop.f32.mrf.mxu1 }
 0x178   : > { %v974_v43 = vpop.f32.mrf.mxu0  ;;  %v1087_v44 = vpop.f32.mrf.mxu1 }
 0x179   : > { %1198 = vxpose.xlu1.b32.cont [9/16] %v1087_v44, 128  ;;  %1134 = vxpose.xlu0.b32.cont [9/16] %v974_v43, 128 }
 0x17a   : > { %v976_v45 = vpop.f32.mrf.mxu0  ;;  %v1089_v46 = vpop.f32.mrf.mxu1 }
 0x17c   : > { %v978_v47 = vpop.f32.mrf.mxu0  ;;  %v1091_v48 = vpop.f32.mrf.mxu1 }
 0x17d   : > { %1199 = vxpose.xlu1.b32.cont [10/16] %v1091_v48, 128  ;;  %1135 = vxpose.xlu0.b32.cont [10/16] %v978_v47, 128 }
 0x17e   : > { %v980_v49 = vpop.f32.mrf.mxu0  ;;  %v1093_v50 = vpop.f32.mrf.mxu1 }
 0x180   : > { %v984_v51 = vpop.f32.mrf.mxu0  ;;  %v1097_v52 = vpop.f32.mrf.mxu1 }
 0x181   : > { %1200 = vxpose.xlu1.b32.cont [11/16] %v1097_v52, 128  ;;  %1136 = vxpose.xlu0.b32.cont [11/16] %v984_v51, 128 }
 0x182   : > { %v986_v53 = vpop.f32.mrf.mxu0  ;;  %v1099_v54 = vpop.f32.mrf.mxu1 }
 0x184   : > { %v988_v55 = vpop.f32.mrf.mxu0  ;;  %v1101_v56 = vpop.f32.mrf.mxu1 }
 0x185   : > { %1201 = vxpose.xlu1.b32.cont [12/16] %v1101_v56, 128  ;;  %1137 = vxpose.xlu0.b32.cont [12/16] %v988_v55, 128 }
 0x186   : > { %v990_v57 = vpop.f32.mrf.mxu0  ;;  %v1103_v58 = vpop.f32.mrf.mxu1 }
 0x188   : > { %v994_v59 = vpop.f32.mrf.mxu0  ;;  %v1107_v60 = vpop.f32.mrf.mxu1 }
 0x189   : > { %1202 = vxpose.xlu1.b32.cont [13/16] %v1107_v60, 128  ;;  %1138 = vxpose.xlu0.b32.cont [13/16] %v994_v59, 128 }
 0x18a   : > { %v996_v61 = vpop.f32.mrf.mxu0  ;;  %v1109_v62 = vpop.f32.mrf.mxu1 }
 0x18c   : > { %v998_v63 = vpop.f32.mrf.mxu0  ;;  %v1111_v0 = vpop.f32.mrf.mxu1 }
 0x18d   : > { %1203 = vxpose.xlu1.b32.cont [14/16] %v1111_v0, 128  ;;  %1139 = vxpose.xlu0.b32.cont [14/16] %v998_v63, 128 }
 0x18e   : > { %v1000_v1 = vpop.f32.mrf.mxu0  ;;  %v1113_v2 = vpop.f32.mrf.mxu1 }
 0x190   : > { %v1004_v3 = vpop.f32.mrf.mxu0  ;;  %v1117_v4 = vpop.f32.mrf.mxu1 }
 0x191   : > { %1204 = vxpose.xlu1.b32.cont [15/16] %v1117_v4, 128  ;;  %1140 = vxpose.xlu0.b32.cont [15/16] %v1004_v3, 128 }
 0x192   : > { %v1006_v5 = vpop.f32.mrf.mxu0  ;;  %v1119_v6 = vpop.f32.mrf.mxu1 }
 0x194   : > { %v1008_v7 = vpop.f32.mrf.mxu0  ;;  %v1121_v8 = vpop.f32.mrf.mxu1 }
 0x195   : > { %1205 = vxpose.xlu1.b32.end [16/16] %v1121_v8, 128  ;;  %1141 = vxpose.xlu0.b32.end [16/16] %v1008_v7, 128 }
 0x196   : > { %v1010_v9 = vpop.f32.mrf.mxu0  ;;  %v1123_v10 = vpop.f32.mrf.mxu1 }
 0x199   : > { %1222 = vxpose.xlu1.b32.start [1/16] (narrow) %v2985_v14, 8  ;;  %1158 = vxpose.xlu0.b32.start [1/16] (narrow) %v2983_v13, 8 }
 0x19d   : > { %1223 = vxpose.xlu1.b32.cont [2/16] (narrow) %v2989_v18, 8  ;;  %1159 = vxpose.xlu0.b32.cont [2/16] (narrow) %v2987_v17, 8 }
 0x1a1   : > { %1224 = vxpose.xlu1.b32.cont [3/16] (narrow) %v2993_v22, 8  ;;  %1160 = vxpose.xlu0.b32.cont [3/16] (narrow) %v2991_v21, 8 }
 0x1a5   : > { %1225 = vxpose.xlu1.b32.cont [4/16] (narrow) %v2997_v26, 8  ;;  %1161 = vxpose.xlu0.b32.cont [4/16] (narrow) %v2995_v25, 8 }
 0x1a9   : > { %1226 = vxpose.xlu1.b32.cont [5/16] (narrow) %v3001_v30, 8  ;;  %1162 = vxpose.xlu0.b32.cont [5/16] (narrow) %v2999_v29, 8 }
 0x1ad   : > { %1227 = vxpose.xlu1.b32.cont [6/16] (narrow) %v3005_v34, 8  ;;  %1163 = vxpose.xlu0.b32.cont [6/16] (narrow) %v3003_v33, 8 }
 0x1b1   : > { %1228 = vxpose.xlu1.b32.cont [7/16] (narrow) %v3009_v38, 8  ;;  %1164 = vxpose.xlu0.b32.cont [7/16] (narrow) %v3007_v37, 8 }
 0x1b5   : > { %1229 = vxpose.xlu1.b32.cont [8/16] (narrow) %v1083_v42, 8  ;;  %1165 = vxpose.xlu0.b32.cont [8/16] (narrow) %v970_v41, 8 }
 0x1b9   : > { %1230 = vxpose.xlu1.b32.cont [9/16] (narrow) %v1089_v46, 8  ;;  %1166 = vxpose.xlu0.b32.cont [9/16] (narrow) %v976_v45, 8 }
 0x1bd   : > { %1231 = vxpose.xlu1.b32.cont [10/16] (narrow) %v1093_v50, 8  ;;  %1167 = vxpose.xlu0.b32.cont [10/16] (narrow) %v980_v49, 8 }
 0x1c1   : > { %1232 = vxpose.xlu1.b32.cont [11/16] (narrow) %v1099_v54, 8  ;;  %1168 = vxpose.xlu0.b32.cont [11/16] (narrow) %v986_v53, 8 }
 0x1c5   : > { %1233 = vxpose.xlu1.b32.cont [12/16] (narrow) %v1103_v58, 8  ;;  %1169 = vxpose.xlu0.b32.cont [12/16] (narrow) %v990_v57, 8 }
 0x1c9   : > { %1234 = vxpose.xlu1.b32.cont [13/16] (narrow) %v1109_v62, 8  ;;  %1170 = vxpose.xlu0.b32.cont [13/16] (narrow) %v996_v61, 8 }
 0x1cd   : > { %1235 = vxpose.xlu1.b32.cont [14/16] (narrow) %v1113_v2, 8  ;;  %1171 = vxpose.xlu0.b32.cont [14/16] (narrow) %v1000_v1, 8 }
 0x1d1   : > { %1236 = vxpose.xlu1.b32.cont [15/16] (narrow) %v1119_v6, 8  ;;  %1172 = vxpose.xlu0.b32.cont [15/16] (narrow) %v1006_v5, 8 }
 0x1d5   : > { %v3025_v11 = vpop.trf.xlu1  ;;  %1237 = vxpose.xlu1.b32.end [16/16] (narrow) %v1123_v10, 8  ;;  %v3027_v12 = vpop.trf.xlu0  ;;  %1173 = vxpose.xlu0.b32.end [16/16] (narrow) %v1010_v9, 8 }
 0x1d6   : > { %v1271_v13 = vmul.f32 %v3025_v11, %v3025_v11  ;;  %v3032_v14 = vand.u32 2147483647, %v3025_v11  ;;  %v1254_v15 = vmul.f32 %v3027_v12, %v3027_v12  ;;  %v3037_v16 = vand.u32 2147483647, %v3027_v12 }
 0x1d7   : > { %vm1815_vm14 = vcmp.lt.f32.partialorder %v3027_v12, 0.0  ;;  %vm1866_vm0 = vcmp.lt.f32.partialorder %v3025_v11, 0.0 }
 0x1d8   : > { %v1288_v17 = vadd.f32 %v1271_v13, %v1254_v15  ;;  %v1475_v18 = vmax.f32 %v3037_v16, %v3032_v14  ;;  %v1492_v48 = vmin.f32 %v3037_v16, %v3032_v14  ;;  %vm1764_vm13 = vcmp.gt.f32.partialorder %v3032_v14, %v3037_v16 }
 0x1d9   : > { %v3041_v19 = vpop.trf.xlu1  ;;  %v3043_v20 = vpop.trf.xlu0 }
 0x1da   : > { %2478 = vrsqrt.f32 %v1288_v17  ;;  %v1509_v21 = vmax.f32 %v1475_v18, 1e-30  ;;  %v1272_v22 = vmul.f32 %v3041_v19, %v3041_v19  ;;  %v3048_v23 = vand.u32 2147483647, %v3041_v19 }
 0x1db   : > { %v1255_v24 = vmul.f32 %v3043_v20, %v3043_v20  ;;  %v3053_v25 = vand.u32 2147483647, %v3043_v20  ;;  %vm1307_vm1 = vcmp.eq.f32.partialorder %v1288_v17, inf  ;;  %vm1309_vm2 = vcmp.eq.f32.partialorder %v1288_v17, 0.0 }
 0x1dc   : > { %2480 = vrcp.f32 %v1509_v21  ;;  %v1310_v53 = vand.u32 2147483648, %v1288_v17 }
 0x1dd   : > { %v3055_v26 = vpop.trf.xlu1  ;;  %v3057_v27 = vpop.trf.xlu0  ;;  %v3059_v28 = vadd.f32 %v1272_v22, %v1255_v24  ;;  %v1476_v29 = vmax.f32 %v3053_v25, %v3048_v23  ;;  %v1493_v59 = vmin.f32 %v3053_v25, %v3048_v23 }
 0x1de   : > { %v1273_v30 = vmul.f32 %v3055_v26, %v3055_v26  ;;  %v1256_v31 = vmul.f32 %v3057_v27, %v3057_v27  ;;  %v3069_v32 = vand.u32 2147483647, %v3055_v26  ;;  %v3074_v35 = vand.u32 2147483647, %v3057_v27 }
 0x1df   : > { %2482 = vrsqrt.f32 %v3059_v28  ;;  %v1510_v33 = vmax.f32 %v1476_v29, 1e-30  ;;  %vm1314_vm3 = vcmp.eq.f32.partialorder %v3059_v28, inf  ;;  %vm1316_vm4 = vcmp.eq.f32.partialorder %v3059_v28, 0.0 }
 0x1e0   : > { %v3071_v34 = vadd.f32 %v1273_v30, %v1256_v31  ;;  %v1477_v40 = vmax.f32 %v3074_v35, %v3069_v32  ;;  %v1317_v2 = vand.u32 2147483648, %v3059_v28  ;;  %v1494_v15 = vmin.f32 %v3074_v35, %v3069_v32 }
 0x1e1   : > { %v3076_v36 = vpop.trf.xlu1  ;;  %v3078_v37 = vpop.trf.xlu0  ;;  %2484 = vrcp.f32 %v1510_v33 }
 0x1e2   : > { %v1274_v38 = vmul.f32 %v3076_v36, %v3076_v36  ;;  %v1257_v39 = vmul.f32 %v3078_v37, %v3078_v37  ;;  %2486 = vrsqrt.f32 %v3071_v34  ;;  %v3088_v41 = vand.u32 2147483647, %v3076_v36 }
 0x1e3   : > { %v3094_v43 = vand.u32 2147483647, %v3078_v37  ;;  %v1511_v46 = vmax.f32 %v1477_v40, 1e-30  ;;  %vm1321_vm5 = vcmp.eq.f32.partialorder %v3071_v34, inf  ;;  %vm1323_vm6 = vcmp.eq.f32.partialorder %v3071_v34, 0.0 }
 0x1e4   : > { %v3091_v42 = vadd.f32 %v1274_v38, %v1257_v39  ;;  %v1324_v13 = vand.u32 2147483648, %v3071_v34 }
 0x1e5   : > { %v3096_v44 = vpop.trf.xlu1  ;;  %v3098_v45 = vpop.trf.xlu0  ;;  %v1478_v52 = vmax.f32 %v3094_v43, %v3088_v41 }
 0x1e6   : > { %2488 = vrsqrt.f32 %v3091_v42  ;;  %v1275_v49 = vmul.f32 %v3096_v44, %v3096_v44  ;;  %v3106_v50 = vand.u32 2147483647, %v3096_v44  ;;  %v1258_v54 = vmul.f32 %v3098_v45, %v3098_v45 }
 0x1e7   : > { %v2479_v47 = vpop.eup %2478  ;;  %2490 = vrcp.f32 %v1511_v46  ;;  %v3113_v55 = vand.u32 2147483647, %v3098_v45  ;;  %v1512_v60 = vmax.f32 %v1478_v52, 1e-30  ;;  %vm1328_vm7 = vcmp.eq.f32.partialorder %v3091_v42, inf }
 0x1e8   : > { %v1306_v51 = vmul.f32 %v2479_v47, %v1288_v17  ;;  %v3122_v63 = vadd.f32 %v1275_v49, %v1258_v54  ;;  %vm1330_vm8 = vcmp.eq.f32.partialorder %v3091_v42, 0.0  ;;  %v1331_v40 = vand.u32 2147483648, %v3091_v42 }
 0x1e9   : > { %v3115_v56 = vpop.trf.xlu1  ;;  %v2481_v57 = vpop.eup %2480  ;;  %v1479_v0 = vmax.f32 %v3113_v55, %v3106_v50  ;;  %2492 = vrcp.f32 %v1512_v60  ;;  %v1495_v47 = vmin.f32 %v3094_v43, %v3088_v41 }
 0x1ea   : > { %v1308_v58 = vsel %vm1307_vm1, %v1288_v17, %v1306_v51  ;;  %v3120_v62 = vmul.f32 %v2481_v57, %v1492_v48  ;;  %v3126_v1 = vpop.trf.xlu0  ;;  %v1276_v3 = vmul.f32 %v3115_v56, %v3115_v56  ;;  %2494 = vrsqrt.f32 %v3122_v63 }
 0x1eb   : > { %v1311_v61 = vsel %vm1309_vm2, %v1310_v53, %v1308_v58  ;;  %v3144_v6 = vand.u32 2147483647, %v3115_v56  ;;  %v1513_v8 = vmax.f32 %v1479_v0, 1e-30  ;;  %v1259_v9 = vmul.f32 %v3126_v1, %v3126_v1 }
 0x1ec   : > { %1424 = vst [vmem:[%s3130_s23] sm:$0xff] %v1311_v61  ;;  %v2483_v4 = vpop.eup %2482  ;;  %v3139_v5 = vmul.f32 %v3120_v62, %v3120_v62  ;;  %v3155_v17 = vand.u32 2147483647, %v3126_v1  ;;  %v1496_v48 = vmin.f32 %v3113_v55, %v3106_v50  ;;  %vm1335_vm9 = vcmp.eq.f32.partialorder %v3122_v63, inf }
 0x1ed   : > { %v1313_v7 = vmul.f32 %v2483_v4, %v3059_v28  ;;  %2496 = vrcp.f32 %v1513_v8  ;;  %v3161_v22 = vadd.f32 %v1276_v3, %v1259_v9  ;;  %v3169_v38 = vpop.trf.xlu1  ;;  %vm1337_vm10 = vcmp.eq.f32.partialorder %v3122_v63, 0.0 }
 0x1ee   : > { %v1577_v10 = vmul.f32 -0.01348047, %v3139_v5  ;;  %v2485_v18 = vpop.eup %2484  ;;  %v1480_v33 = vmax.f32 %v3155_v17, %v3144_v6  ;;  %v3185_v49 = vpop.trf.xlu0  ;;  %v1277_v54 = vmul.f32 %v3169_v38, %v3169_v38  ;;  %v3194_v57 = vand.u32 2147483647, %v3169_v38 }
 0x1ef   : > { %v1315_v21 = vsel %vm1314_vm3, %v3059_v28, %v1313_v7  ;;  %v2487_v24 = vpop.eup %2486  ;;  %v3165_v31 = vmul.f32 %v2485_v18, %v1493_v59  ;;  %2498 = vrsqrt.f32 %v3161_v22  ;;  %v1260_v3 = vmul.f32 %v3185_v49, %v3185_v49 }
 0x1f0   : > { %v1594_v29 = vadd.f32 0.057477314, %v1577_v10  ;;  %v1318_v30 = vsel %vm1316_vm4, %v1317_v2, %v1315_v21  ;;  %v1320_v39 = vmul.f32 %v2487_v24, %v3071_v34  ;;  %v1514_v53 = vmax.f32 %v1480_v33, 1e-30 }
 0x1f1   : > { %1425 = vst [vmem:[%s3130_s23 + $0x8] sm:$0xff] %v1318_v30  ;;  %v3179_v28 = vmul.f32 %v3165_v31, %v3165_v31  ;;  %v3206_v4 = vand.u32 2147483647, %v3185_v49  ;;  %vm1342_vm11 = vcmp.eq.f32.partialorder %v3161_v22, inf  ;;  %vm1344_vm12 = vcmp.eq.f32.partialorder %v3161_v22, 0.0 }
 0x1f2   : > { %v1611_v46 = vmul.f32 %v1594_v29, %v3139_v5  ;;  %v1322_v52 = vsel %vm1321_vm5, %v3071_v34, %v1320_v39  ;;  %2500 = vrcp.f32 %v1514_v53  ;;  %v1338_v29 = vand.u32 2147483648, %v3122_v63 }
 0x1f3   : > { %v2489_v51 = vpop.eup %2488  ;;  %v1578_v60 = vmul.f32 -0.01348047, %v3179_v28  ;;  %v1325_v61 = vsel %vm1323_vm6, %v1324_v13, %v1322_v52  ;;  %v3219_v13 = vadd.f32 %v1277_v54, %v1260_v3  ;;  %v1498_v3 = vmin.f32 %v3206_v4, %v3194_v57 }
 0x1f4   : > { %v2491_v58 = vpop.eup %2490  ;;  %v2204_v59 = vadd.f32 -0.12123907, %v1611_v46  ;;  %v1327_v0 = vmul.f32 %v2489_v51, %v3091_v42  ;;  %1426 = vst [vmem:[%s3130_s23 + $0x10] sm:$0xff] %v1325_v61  ;;  %v1345_v51 = vand.u32 2147483648, %v3161_v22  ;;  %vm1765_vm1 = vcmp.gt.f32.partialorder %v3048_v23, %v3053_v25 }
 0x1f5   : > { %v3201_v2 = vmul.f32 %v2491_v58, %v1494_v15  ;;  %v1595_v8 = vadd.f32 0.057477314, %v1578_v60  ;;  %v1481_v15 = vmax.f32 %v3206_v4, %v3194_v57  ;;  %2502 = vrsqrt.f32 %v3219_v13  ;;  %v3241_v58 = vpop.trf.xlu1 }
 0x1f6   : > { %v1645_v7 = vmul.f32 %v2204_v59, %v3139_v5  ;;  %v1329_v34 = vsel %vm1328_vm7, %v3091_v42, %v1327_v0  ;;  %v2493_v18 = vpop.eup %2492  ;;  %vm1349_vm15 = vcmp.eq.f32.partialorder %v3219_v13, inf  ;;  %vm1351_vm2 = vcmp.eq.f32.partialorder %v3219_v13, 0.0 }
 0x1f7   : > { %v3215_v9 = vmul.f32 %v3201_v2, %v3201_v2  ;;  %v1332_v10 = vsel %vm1330_vm8, %v1331_v40, %v1329_v34  ;;  %v1612_v24 = vmul.f32 %v1595_v8, %v3179_v28  ;;  %v2495_v30 = vpop.eup %2494  ;;  %v3228_v39 = vmul.f32 %v2493_v18, %v1495_v47 }
 0x1f8   : > { %v1662_v21 = vadd.f32 0.19563593, %v1645_v7  ;;  %1427 = vst [vmem:[%s3130_s23 + $0x18] sm:$0xff] %v1332_v10  ;;  %v1334_v46 = vmul.f32 %v2495_v30, %v3122_v63  ;;  %v1497_v47 = vmin.f32 %v3155_v17, %v3144_v6  ;;  %v1515_v54 = vmax.f32 %v1481_v15, 1e-30  ;;  %v3257_v15 = vpop.trf.xlu0 }
 0x1f9   : > { %v1579_v33 = vmul.f32 -0.01348047, %v3215_v9  ;;  %v2205_v40 = vadd.f32 -0.12123907, %v1612_v24  ;;  %v3237_v53 = vmul.f32 %v3228_v39, %v3228_v39  ;;  %v1278_v30 = vmul.f32 %v3241_v58, %v3241_v58 }
 0x1fa   : > { %v1679_v42 = vmul.f32 %v1662_v21, %v3139_v5  ;;  %v2497_v59 = vpop.eup %2496  ;;  %v1336_v0 = vsel %vm1335_vm9, %v3122_v63, %v1334_v46  ;;  %2504 = vrcp.f32 %v1515_v54  ;;  %vm1816_vm3 = vcmp.lt.f32.partialorder %v3043_v20, 0.0 }
 0x1fb   : > { %v1596_v52 = vadd.f32 0.057477314, %v1579_v33  ;;  %v1646_v61 = vmul.f32 %v2205_v40, %v3179_v28  ;;  %v1580_v8 = vmul.f32 -0.01348047, %v3237_v53  ;;  %v1339_v34 = vsel %vm1337_vm10, %v1338_v29, %v1336_v0 }
 0x1fc   : > { %v2221_v60 = vadd.f32 -0.3329946, %v1679_v42  ;;  %v3255_v10 = vmul.f32 %v2497_v59, %v1496_v48  ;;  %v2499_v18 = vpop.eup %2498  ;;  %1428 = vst [vmem:[%s3130_s23 + $0x20] sm:$0xff] %v1339_v34  ;;  %vm1766_vm4 = vcmp.gt.f32.partialorder %v3069_v32, %v3074_v35  ;;  %vm1867_vm5 = vcmp.lt.f32.partialorder %v3041_v19, 0.0 }
 0x1fd   : > { %v1613_v7 = vmul.f32 %v1596_v52, %v3215_v9  ;;  %v1663_v24 = vadd.f32 0.19563593, %v1646_v61  ;;  %v1597_v42 = vadd.f32 0.057477314, %v1580_v8  ;;  %v1341_v63 = vmul.f32 %v2499_v18, %v3161_v22 }
 0x1fe   : > { %v1713_v21 = vmul.f32 %v2221_v60, %v3139_v5  ;;  %v3265_v40 = vmul.f32 %v3255_v10, %v3255_v10  ;;  %v1261_v5 = vmul.f32 %v3257_v15, %v3257_v15  ;;  %vm1817_vm6 = vcmp.lt.f32.partialorder %v3057_v27, 0.0 }
 0x1ff   : > { %v2206_v33 = vadd.f32 -0.12123907, %v1613_v7  ;;  %v1680_v29 = vmul.f32 %v1663_v24, %v3179_v28  ;;  %v1614_v52 = vmul.f32 %v1597_v42, %v3237_v53  ;;  %v1343_v59 = vsel %vm1342_vm11, %v3161_v22, %v1341_v63  ;;  %v2501_v60 = vpop.eup %2500 }
 0x200   : > { %v1730_v48 = vadd.f32 0.99999565, %v1713_v21  ;;  %v1581_v54 = vmul.f32 -0.01348047, %v3265_v40  ;;  %v1346_v7 = vsel %vm1344_vm12, %v1345_v51, %v1343_v59  ;;  %v3282_v8 = vadd.f32 %v1278_v30, %v1261_v5 }
 0x201   : > { %v1647_v46 = vmul.f32 %v2206_v33, %v3215_v9  ;;  %v2222_v0 = vadd.f32 -0.3329946, %v1680_v29  ;;  %v2207_v18 = vadd.f32 -0.12123907, %v1614_v52  ;;  %1429 = vst [vmem:[%s3130_s23 + $0x28] sm:$0xff] %v1346_v7  ;;  %v3288_v24 = vmul.f32 %v2501_v60, %v1497_v47 }
 0x202   : > { %v1747_v61 = vmul.f32 %v1730_v48, %v3120_v62  ;;  %v1598_v21 = vadd.f32 0.057477314, %v1581_v54  ;;  %2506 = vrsqrt.f32 %v3282_v8  ;;  %v2503_v63 = vpop.eup %2502  ;;  %v1352_v48 = vand.u32 2147483648, %v3219_v13 }
 0x203   : > { %v1664_v34 = vadd.f32 0.19563593, %v1647_v46  ;;  %v1714_v62 = vmul.f32 %v2222_v0, %v3179_v28  ;;  %v1648_v51 = vmul.f32 %v2207_v18, %v3237_v53  ;;  %v3298_v42 = vmul.f32 %v3288_v24, %v3288_v24 }
 0x204   : > { %v1781_v33 = vsub.f32 1.5707964, %v1747_v61  ;;  %v1615_v30 = vmul.f32 %v1598_v21, %v3265_v40  ;;  %v3306_v29 = vand.u32 2147483647, %v3241_v58  ;;  %v1348_v54 = vmul.f32 %v2503_v63, %v3219_v13 }
 0x205   : > { %v1681_v22 = vmul.f32 %v1664_v34, %v3215_v9  ;;  %v1731_v28 = vadd.f32 0.99999565, %v1714_v62  ;;  %v1665_v52 = vadd.f32 0.19563593, %v1648_v51  ;;  %v1582_v16 = vmul.f32 -0.01348047, %v3298_v42 }
 0x206   : > { %v1798_v47 = vsel %vm1764_vm13, %v1781_v33, %v1747_v61  ;;  %v2208_v14 = vadd.f32 -0.12123907, %v1615_v30  ;;  %v3314_v60 = vand.u32 2147483647, %v3257_v15  ;;  %vm1767_vm7 = vcmp.gt.f32.partialorder %v3088_v41, %v3094_v43 }
 0x207   : > { %v1832_v5 = vsub.f32 3.1415927, %v1798_v47  ;;  %v2223_v46 = vadd.f32 -0.3329946, %v1681_v22  ;;  %v1748_v59 = vmul.f32 %v1731_v28, %v3165_v31  ;;  %v1682_v7 = vmul.f32 %v1665_v52, %v3237_v53  ;;  %v2505_v62 = vpop.eup %2504 }
 0x208   : > { %v1350_v31 = vsel %vm1349_vm15, %v3219_v13, %v1348_v54  ;;  %v1649_v21 = vmul.f32 %v2208_v14, %v3265_v40  ;;  %v1599_v33 = vadd.f32 0.057477314, %v1582_v16  ;;  %v1482_v51 = vmax.f32 %v3314_v60, %v3306_v29 }
 0x209   : > { %v1849_v61 = vsel %vm1815_vm14, %v1832_v5, %v1798_v47  ;;  %v1715_v0 = vmul.f32 %v2223_v46, %v3215_v9  ;;  %v1782_v18 = vsub.f32 1.5707964, %v1748_v59  ;;  %v2224_v22 = vadd.f32 -0.3329946, %v1682_v7  ;;  %v3367_v7 = vpop.trf.xlu1 }
 0x20a   : > { %v1883_v34 = vsub.f32 0.0, %v1849_v61  ;;  %v1353_v9 = vsel %vm1351_vm2, %v1352_v48, %v1350_v31  ;;  %v1666_v47 = vadd.f32 0.19563593, %v1649_v21  ;;  %v1616_v28 = vmul.f32 %v1599_v33, %v3298_v42 }
 0x20b   : > { %v1732_v12 = vadd.f32 0.99999565, %v1715_v0  ;;  %v1799_v63 = vsel %vm1765_vm1, %v1782_v18, %v1748_v59  ;;  %1430 = vst [vmem:[%s3130_s23 + $0x30] sm:$0xff] %v1353_v9  ;;  %v1716_v48 = vmul.f32 %v2224_v22, %v3237_v53  ;;  %v3349_v23 = vmul.f32 %v2505_v62, %v1498_v3 }
 0x20c   : > { %v1900_v30 = vsel %vm1866_vm0, %v1883_v34, %v1849_v61  ;;  %v1833_v13 = vsub.f32 3.1415927, %v1799_v63  ;;  %vm1868_vm8 = vcmp.lt.f32.partialorder %v3055_v26, 0.0  ;;  %v1683_v25 = vmul.f32 %v1666_v47, %v3265_v40 }
 0x20d   : > { %1917 = vst [vmem:[%s3341_s22] sm:$0xff] %v1900_v30  ;;  %v1749_v11 = vmul.f32 %v1732_v12, %v3201_v2  ;;  %v2209_v5 = vadd.f32 -0.12123907, %v1616_v28  ;;  %vm1356_vm9 = vcmp.eq.f32.partialorder %v3282_v8, inf  ;;  %v1516_v46 = vmax.f32 %v1482_v51, 1e-30  ;;  %v3387_v30 = vpop.trf.xlu0 }
 0x20e   : > { %v1850_v52 = vsel %vm1816_vm3, %v1833_v13, %v1799_v63  ;;  %v1733_v2 = vadd.f32 0.99999565, %v1716_v48  ;;  %v3358_v53 = vmul.f32 %v3349_v23, %v3349_v23  ;;  %v2225_v59 = vadd.f32 -0.3329946, %v1683_v25 }
 0x20f   : > { %v1783_v54 = vsub.f32 1.5707964, %v1749_v11  ;;  %v1884_v3 = vsub.f32 0.0, %v1850_v52  ;;  %v1650_v14 = vmul.f32 %v2209_v5, %v3298_v42  ;;  %2508 = vrcp.f32 %v1516_v46  ;;  %v2507_v16 = vpop.eup %2506 }
 0x210   : > { %v1750_v20 = vmul.f32 %v1733_v2, %v3228_v39  ;;  %v1583_v0 = vmul.f32 -0.01348047, %v3358_v53  ;;  %vm1358_vm10 = vcmp.eq.f32.partialorder %v3282_v8, 0.0  ;;  %v1717_v18 = vmul.f32 %v2225_v59, %v3265_v40 }
 0x211   : > { %v1800_v61 = vsel %vm1766_vm4, %v1783_v54, %v1749_v11  ;;  %v1901_v31 = vsel %vm1867_vm5, %v1884_v3, %v1850_v52  ;;  %v1667_v21 = vadd.f32 0.19563593, %v1650_v14  ;;  %v1355_v32 = vmul.f32 %v2507_v16, %v3282_v8 }
 0x212   : > { %v1834_v34 = vsub.f32 3.1415927, %v1800_v61  ;;  %1918 = vst [vmem:[%s3341_s22 + $0x8] sm:$0xff] %v1901_v31  ;;  %v1784_v33 = vsub.f32 1.5707964, %v1750_v20  ;;  %v1359_v35 = vand.u32 2147483648, %v3282_v8  ;;  %v1279_v19 = vmul.f32 %v3367_v7, %v3367_v7 }
 0x213   : > { %v1600_v62 = vadd.f32 0.057477314, %v1583_v0  ;;  %v1734_v12 = vadd.f32 0.99999565, %v1717_v18  ;;  %v1684_v22 = vmul.f32 %v1667_v21, %v3298_v42  ;;  %v1357_v27 = vsel %vm1356_vm9, %v3282_v8, %v1355_v32 }
 0x214   : > { %v1851_v39 = vsel %vm1817_vm6, %v1834_v34, %v1800_v61  ;;  %v1801_v9 = vsel %vm1767_vm7, %v1784_v33, %v1750_v20  ;;  %v1360_v13 = vsel %vm1358_vm10, %v1359_v35, %v1357_v27  ;;  %vm1818_vm11 = vcmp.lt.f32.partialorder %v3078_v37, 0.0 }
 0x215   : > { %v1885_v40 = vsub.f32 0.0, %v1851_v39  ;;  %v1617_v51 = vmul.f32 %v1600_v62, %v3358_v53  ;;  %v1835_v63 = vsub.f32 3.1415927, %v1801_v9  ;;  %v1751_v47 = vmul.f32 %v1734_v12, %v3255_v10  ;;  %1431 = vst [vmem:[%s3130_s23 + $0x38] sm:$0xff] %v1360_v13 }
 0x216   : > { %v2226_v28 = vadd.f32 -0.3329946, %v1684_v22  ;;  %v3397_v43 = vand.u32 2147483647, %v3367_v7  ;;  %v1262_v8 = vmul.f32 %v3387_v30, %v3387_v30  ;;  %vm1768_vm12 = vcmp.gt.f32.partialorder %v3106_v50, %v3113_v55 }
 0x217   : > { %v1902_v11 = vsel %vm1868_vm8, %v1885_v40, %v1851_v39  ;;  %v2210_v41 = vadd.f32 -0.12123907, %v1617_v51  ;;  %v1852_v48 = vsel %vm1818_vm11, %v1835_v63, %v1801_v9  ;;  %v1785_v25 = vsub.f32 1.5707964, %v1751_v47 }
 0x218   : > { %1919 = vst [vmem:[%s3341_s22 + $0x10] sm:$0xff] %v1902_v11  ;;  %v1718_v10 = vmul.f32 %v2226_v28, %v3298_v42  ;;  %v1886_v5 = vsub.f32 0.0, %v1852_v48  ;;  %v3407_v37 = vand.u32 2147483647, %v3387_v30  ;;  %vm1869_vm13 = vcmp.lt.f32.partialorder %v3076_v36, 0.0  ;;  %v3420_v36 = vpop.trf.xlu1 }
 0x219   : > { %v1651_v26 = vmul.f32 %v2210_v41, %v3358_v53  ;;  %v1802_v46 = vsel %vm1768_vm12, %v1785_v25, %v1751_v47  ;;  %v3410_v54 = vadd.f32 %v1279_v19, %v1262_v8  ;;  %vm1819_vm14 = vcmp.lt.f32.partialorder %v3098_v45, 0.0 }
 0x21a   : > { %v1735_v52 = vadd.f32 0.99999565, %v1718_v10  ;;  %v1903_v2 = vsel %vm1869_vm13, %v1886_v5, %v1852_v48  ;;  %v1836_v42 = vsub.f32 3.1415927, %v1802_v46  ;;  %v1483_v59 = vmax.f32 %v3407_v37, %v3397_v43 }
 0x21b   : > { %v1668_v3 = vadd.f32 0.19563593, %v1651_v26  ;;  %1920 = vst [vmem:[%s3341_s22 + $0x18] sm:$0xff] %v1903_v2  ;;  %v1499_v55 = vmin.f32 %v3314_v60, %v3306_v29  ;;  %2510 = vrsqrt.f32 %v3410_v54  ;;  %vm1870_vm15 = vcmp.lt.f32.partialorder %v3096_v44, 0.0 }
 0x21c   : > { %v1752_v50 = vmul.f32 %v1735_v52, %v3288_v24  ;;  %v2509_v14 = vpop.eup %2508  ;;  %v1853_v16 = vsel %vm1819_vm14, %v1836_v42, %v1802_v46  ;;  %v1517_v45 = vmax.f32 %v1483_v59, 1e-30  ;;  %v3426_v24 = vpop.trf.xlu0  ;;  %vm1769_vm0 = vcmp.gt.f32.partialorder %v3144_v6, %v3155_v17 }
 0x21d   : > { %v1685_v61 = vmul.f32 %v1668_v3, %v3358_v53  ;;  %v1887_v20 = vsub.f32 0.0, %v1853_v16  ;;  %v3424_v31 = vmul.f32 %v2509_v14, %v1499_v55  ;;  %v1280_v18 = vmul.f32 %v3420_v36, %v3420_v36  ;;  %v3448_v12 = vpop.trf.xlu1 }
 0x21e   : > { %v1786_v0 = vsub.f32 1.5707964, %v1752_v50  ;;  %v3433_v44 = vand.u32 2147483647, %v3420_v36  ;;  %2512 = vrcp.f32 %v1517_v45  ;;  %v1263_v6 = vmul.f32 %v3426_v24, %v3426_v24 }
 0x21f   : > { %v2227_v34 = vadd.f32 -0.3329946, %v1685_v61  ;;  %v1904_v21 = vsel %vm1870_vm15, %v1887_v20, %v1853_v16  ;;  %v3437_v62 = vmul.f32 %v3424_v31, %v3424_v31  ;;  %v3444_v17 = vand.u32 2147483647, %v3426_v24 }
 0x220   : > { %v1803_v33 = vsel %vm1769_vm0, %v1786_v0, %v1752_v50  ;;  %1921 = vst [vmem:[%s3341_s22 + $0x20] sm:$0xff] %v1904_v21  ;;  %vm1820_vm1 = vcmp.lt.f32.partialorder %v3126_v1, 0.0  ;;  %v3450_v40 = vadd.f32 %v1280_v18, %v1263_v6  ;;  %vm1871_vm2 = vcmp.lt.f32.partialorder %v3115_v56, 0.0  ;;  %v3455_v27 = vpop.trf.xlu0 }
 0x221   : > { %v1837_v32 = vsub.f32 3.1415927, %v1803_v33  ;;  %v1719_v35 = vmul.f32 %v2227_v34, %v3358_v53  ;;  %v1584_v39 = vmul.f32 -0.01348047, %v3437_v62  ;;  %v1484_v53 = vmax.f32 %v3444_v17, %v3433_v44  ;;  %v3474_v25 = vpop.trf.xlu1 }
 0x222   : > { %2514 = vrsqrt.f32 %v3450_v40  ;;  %v1281_v63 = vmul.f32 %v3448_v12, %v3448_v12  ;;  %v3462_v47 = vand.u32 2147483647, %v3448_v12  ;;  %v1264_v41 = vmul.f32 %v3455_v27, %v3455_v27 }
 0x223   : > { %v1854_v22 = vsel %vm1820_vm1, %v1837_v32, %v1803_v33  ;;  %v1736_v19 = vadd.f32 0.99999565, %v1719_v35  ;;  %v1601_v51 = vadd.f32 0.057477314, %v1584_v39  ;;  %v1518_v11 = vmax.f32 %v1484_v53, 1e-30 }
 0x224   : > { %v1888_v9 = vsub.f32 0.0, %v1854_v22  ;;  %v3469_v48 = vand.u32 2147483647, %v3455_v27  ;;  %vm1770_vm3 = vcmp.gt.f32.partialorder %v3194_v57, %v3206_v4  ;;  %vm1821_vm4 = vcmp.lt.f32.partialorder %v3185_v49, 0.0  ;;  %v3490_v3 = vpop.trf.xlu0 }
 0x225   : > { %v1753_v1 = vmul.f32 %v1736_v19, %v3349_v23  ;;  %v1618_v13 = vmul.f32 %v1601_v51, %v3437_v62  ;;  %2516 = vrcp.f32 %v1518_v11  ;;  %vm1363_vm5 = vcmp.eq.f32.partialorder %v3410_v54, inf  ;;  %v3515_v32 = vpop.trf.xlu1 }
 0x226   : > { %v1905_v28 = vsel %vm1871_vm2, %v1888_v9, %v1854_v22  ;;  %v3477_v5 = vadd.f32 %v1281_v63, %v1264_v41  ;;  %v1485_v26 = vmax.f32 %v3469_v48, %v3462_v47  ;;  %vm1365_vm6 = vcmp.eq.f32.partialorder %v3410_v54, 0.0 }
 0x227   : > { %1922 = vst [vmem:[%s3341_s22 + $0x28] sm:$0xff] %v1905_v28  ;;  %v1787_v56 = vsub.f32 1.5707964, %v1753_v1  ;;  %v2211_v23 = vadd.f32 -0.12123907, %v1618_v13  ;;  %v1366_v4 = vand.u32 2147483648, %v3410_v54  ;;  %v1500_v2 = vmin.f32 %v3407_v37, %v3397_v43 }
 0x228   : > { %v2511_v10 = vpop.eup %2510  ;;  %2518 = vrsqrt.f32 %v3477_v5  ;;  %v1282_v42 = vmul.f32 %v3474_v25, %v3474_v25  ;;  %v1519_v14 = vmax.f32 %v1485_v26, 1e-30  ;;  %vm1872_vm7 = vcmp.lt.f32.partialorder %v3169_v38, 0.0  ;;  %v3522_v39 = vpop.trf.xlu0 }
 0x229   : > { %v1804_v8 = vsel %vm1770_vm3, %v1787_v56, %v1753_v1  ;;  %v1652_v52 = vmul.f32 %v2211_v23, %v3437_v62  ;;  %v1362_v57 = vmul.f32 %v2511_v10, %v3410_v54  ;;  %v3497_v0 = vand.u32 2147483647, %v3474_v25 }
 0x22a   : > { %v1838_v46 = vsub.f32 3.1415927, %v1804_v8  ;;  %2520 = vrcp.f32 %v1519_v14  ;;  %v1265_v49 = vmul.f32 %v3490_v3, %v3490_v3  ;;  %vm1370_vm8 = vcmp.eq.f32.partialorder %v3450_v40, inf }
 0x22b   : > { %v1669_v50 = vadd.f32 0.19563593, %v1652_v52  ;;  %v1364_v55 = vsel %vm1363_vm5, %v3410_v54, %v1362_v57  ;;  %v2513_v16 = vpop.eup %2512  ;;  %v3506_v54 = vand.u32 2147483647, %v3490_v3  ;;  %v1501_v35 = vmin.f32 %v3444_v17, %v3433_v44 }
 0x22c   : > { %v1855_v59 = vsel %vm1821_vm4, %v1838_v46, %v1804_v8  ;;  %v1367_v20 = vsel %vm1365_vm6, %v1366_v4, %v1364_v55  ;;  %v3501_v34 = vmul.f32 %v2513_v16, %v1500_v2  ;;  %v3513_v33 = vadd.f32 %v1282_v42, %v1265_v49  ;;  %v3558_v4 = vpop.trf.xlu1 }
 0x22d   : > { %v1889_v61 = vsub.f32 0.0, %v1855_v59  ;;  %v1686_v45 = vmul.f32 %v1669_v50, %v3437_v62  ;;  %1432 = vst [vmem:[%s3130_s23 + $0x40] sm:$0xff] %v1367_v20  ;;  %v1486_v6 = vmax.f32 %v3506_v54, %v3497_v0  ;;  %v1373_v9 = vand.u32 2147483648, %v3450_v40 }
 0x22e   : > { %v3511_v21 = vmul.f32 %v3501_v34, %v3501_v34  ;;  %2522 = vrsqrt.f32 %v3513_v33  ;;  %v1283_v63 = vmul.f32 %v3515_v32, %v3515_v32  ;;  %v3532_v28 = vand.u32 2147483647, %v3515_v32 }
 0x22f   : > { %v1906_v18 = vsel %vm1872_vm7, %v1889_v61, %v1855_v59  ;;  %v2228_v38 = vadd.f32 -0.3329946, %v1686_v45  ;;  %v2515_v22 = vpop.eup %2514  ;;  %v1520_v1 = vmax.f32 %v1486_v6, 1e-30  ;;  %v3537_v56 = vand.u32 2147483647, %v3522_v39  ;;  %v3576_v45 = vpop.trf.xlu0 }
 0x230   : > { %1923 = vst [vmem:[%s3341_s22 + $0x30] sm:$0xff] %v1906_v18  ;;  %v1585_v53 = vmul.f32 -0.01348047, %v3511_v21  ;;  %v1369_v51 = vmul.f32 %v2515_v22, %v3450_v40  ;;  %vm1771_vm9 = vcmp.gt.f32.partialorder %v3306_v29, %v3314_v60  ;;  %vm1372_vm10 = vcmp.eq.f32.partialorder %v3450_v40, 0.0 }
 0x231   : > { %v1720_v19 = vmul.f32 %v2228_v38, %v3437_v62  ;;  %v1266_v62 = vmul.f32 %v3522_v39, %v3522_v39  ;;  %2524 = vrcp.f32 %v1520_v1  ;;  %vm1873_vm11 = vcmp.lt.f32.partialorder %v3241_v58, 0.0 }
 0x232   : > { %v1602_v11 = vadd.f32 0.057477314, %v1585_v53  ;;  %v2517_v41 = vpop.eup %2516  ;;  %v1371_v23 = vsel %vm1370_vm8, %v3450_v40, %v1369_v51  ;;  %vm1822_vm12 = vcmp.lt.f32.partialorder %v3257_v15, 0.0  ;;  %v1502_v52 = vmin.f32 %v3469_v48, %v3462_v47 }
 0x233   : > { %v1737_v13 = vadd.f32 0.99999565, %v1720_v19  ;;  %v1374_v26 = vsel %vm1372_vm10, %v1373_v9, %v1371_v23  ;;  %v3547_v46 = vmul.f32 %v2517_v41, %v1501_v35  ;;  %v3554_v57 = vadd.f32 %v1283_v63, %v1266_v62 }
 0x234   : > { %v1619_v8 = vmul.f32 %v1602_v11, %v3511_v21  ;;  %1433 = vst [vmem:[%s3130_s23 + $0x48] sm:$0xff] %v1374_v26  ;;  %v1487_v40 = vmax.f32 %v3537_v56, %v3532_v28  ;;  %vm1377_vm13 = vcmp.eq.f32.partialorder %v3477_v5, inf  ;;  %vm1379_vm14 = vcmp.eq.f32.partialorder %v3477_v5, 0.0 }
 0x235   : > { %v1754_v10 = vmul.f32 %v1737_v13, %v3424_v31  ;;  %v2519_v31 = vpop.eup %2518  ;;  %v3562_v59 = vmul.f32 %v3547_v46, %v3547_v46  ;;  %v1380_v55 = vand.u32 2147483648, %v3477_v5  ;;  %2526 = vrsqrt.f32 %v3554_v57 }
 0x236   : > { %v2212_v42 = vadd.f32 -0.12123907, %v1619_v8  ;;  %v1376_v50 = vmul.f32 %v2519_v31, %v3477_v5  ;;  %v1284_v20 = vmul.f32 %v3558_v4, %v3558_v4  ;;  %v1521_v35 = vmax.f32 %v1487_v40, 1e-30 }
 0x237   : > { %v1788_v2 = vsub.f32 1.5707964, %v1754_v10  ;;  %v1586_v61 = vmul.f32 -0.01348047, %v3562_v59  ;;  %v2521_v49 = vpop.eup %2520  ;;  %v3580_v6 = vand.u32 2147483647, %v3558_v4  ;;  %v1267_v9 = vmul.f32 %v3576_v45, %v3576_v45 }
 0x238   : > { %v1653_v16 = vmul.f32 %v2212_v42, %v3511_v21  ;;  %v1378_v38 = vsel %vm1377_vm13, %v3477_v5, %v1376_v50  ;;  %v3582_v19 = vmul.f32 %v2521_v49, %v1502_v52  ;;  %2528 = vrcp.f32 %v1521_v35 }
 0x239   : > { %v1805_v14 = vsel %vm1771_vm9, %v1788_v2, %v1754_v10  ;;  %v1603_v60 = vadd.f32 0.057477314, %v1586_v61  ;;  %v1381_v22 = vsel %vm1379_vm14, %v1380_v55, %v1378_v38  ;;  %v3590_v5 = vand.u32 2147483647, %v3576_v45  ;;  %v3619_v55 = vpop.trf.xlu1  ;;  %v3631_v38 = vpop.trf.xlu0 }
 0x23a   : > { %v1839_v18 = vsub.f32 3.1415927, %v1805_v14  ;;  %v1670_v29 = vadd.f32 0.19563593, %v1653_v16  ;;  %1434 = vst [vmem:[%s3130_s23 + $0x50] sm:$0xff] %v1381_v22  ;;  %v3596_v13 = vmul.f32 %v3582_v19, %v3582_v19  ;;  %vm1384_vm15 = vcmp.eq.f32.partialorder %v3513_v33, inf }
 0x23b   : > { %v1620_v63 = vmul.f32 %v1603_v60, %v3562_v59  ;;  %v2523_v15 = vpop.eup %2522  ;;  %v1503_v11 = vmin.f32 %v3506_v54, %v3497_v0  ;;  %v3601_v62 = vadd.f32 %v1284_v20, %v1267_v9  ;;  %v1488_v41 = vmax.f32 %v3590_v5, %v3580_v6 }
 0x23c   : > { %v1856_v53 = vsel %vm1822_vm12, %v1839_v18, %v1805_v14  ;;  %v1687_v1 = vmul.f32 %v1670_v29, %v3511_v21  ;;  %v1587_v26 = vmul.f32 -0.01348047, %v3596_v13  ;;  %vm1772_vm0 = vcmp.gt.f32.partialorder %v3397_v43, %v3407_v37 }
 0x23d   : > { %v1890_v51 = vsub.f32 0.0, %v1856_v53  ;;  %v2213_v8 = vadd.f32 -0.12123907, %v1620_v63  ;;  %v1383_v52 = vmul.f32 %v2523_v15, %v3513_v33  ;;  %vm1386_vm1 = vcmp.eq.f32.partialorder %v3513_v33, 0.0 }
 0x23e   : > { %v2229_v10 = vadd.f32 -0.3329946, %v1687_v1  ;;  %v1387_v40 = vand.u32 2147483648, %v3513_v33  ;;  %2530 = vrsqrt.f32 %v3601_v62  ;;  %v2525_v31 = vpop.eup %2524  ;;  %v1604_v42 = vadd.f32 0.057477314, %v1587_v26 }
 0x23f   : > { %v1907_v23 = vsel %vm1873_vm11, %v1890_v51, %v1856_v53  ;;  %v1654_v2 = vmul.f32 %v2213_v8, %v3562_v59  ;;  %v1504_v50 = vmin.f32 %v3537_v56, %v3532_v28  ;;  %v1385_v14 = vsel %vm1384_vm15, %v3513_v33, %v1383_v52 }
 0x240   : > { %1924 = vst [vmem:[%s3341_s22 + $0x38] sm:$0xff] %v1907_v23  ;;  %v1721_v58 = vmul.f32 %v2229_v10, %v3511_v21  ;;  %v3624_v16 = vmul.f32 %v2525_v31, %v1503_v11  ;;  %vm1391_vm2 = vcmp.eq.f32.partialorder %v3554_v57, inf  ;;  %v1522_v61 = vmax.f32 %v1488_v41, 1e-30 }
 0x241   : > { %vm1823_vm3 = vcmp.lt.f32.partialorder %v3387_v30, 0.0  ;;  %v1671_v21 = vadd.f32 0.19563593, %v1654_v2  ;;  %v1621_v49 = vmul.f32 %v1604_v42, %v3596_v13  ;;  %v1388_v18 = vsel %vm1386_vm1, %v1387_v40, %v1385_v14 }
 0x242   : > { %v1738_v20 = vadd.f32 0.99999565, %v1721_v58  ;;  %1435 = vst [vmem:[%s3130_s23 + $0x58] sm:$0xff] %v1388_v18  ;;  %v3636_v35 = vmul.f32 %v3624_v16, %v3624_v16  ;;  %2532 = vrcp.f32 %v1522_v61  ;;  %v1285_v29 = vmul.f32 %v3619_v55, %v3619_v55  ;;  %v2527_v22 = vpop.eup %2526 }
 0x243   : > { %v3641_v60 = vand.u32 2147483647, %v3619_v55  ;;  %v1688_v33 = vmul.f32 %v1671_v21, %v3562_v59  ;;  %v2214_v9 = vadd.f32 -0.12123907, %v1621_v49  ;;  %vm1393_vm4 = vcmp.eq.f32.partialorder %v3554_v57, 0.0 }
 0x244   : > { %v1755_v53 = vmul.f32 %v1738_v20, %v3501_v34  ;;  %vm1874_vm5 = vcmp.lt.f32.partialorder %v3367_v7, 0.0  ;;  %v1588_v51 = vmul.f32 -0.01348047, %v3636_v35  ;;  %v1390_v1 = vmul.f32 %v2527_v22, %v3554_v57 }
 0x245   : > { %v1268_v63 = vmul.f32 %v3631_v38, %v3631_v38  ;;  %v3652_v15 = vand.u32 2147483647, %v3631_v38  ;;  %v2230_v34 = vadd.f32 -0.3329946, %v1688_v33  ;;  %v1655_v41 = vmul.f32 %v2214_v9, %v3596_v13  ;;  %v2529_v40 = vpop.eup %2528 }
 0x246   : > { %v1789_v11 = vsub.f32 1.5707964, %v1755_v53  ;;  %v1394_v23 = vand.u32 2147483648, %v3554_v57  ;;  %v1605_v10 = vadd.f32 0.057477314, %v1588_v51  ;;  %v1392_v8 = vsel %vm1391_vm2, %v3554_v57, %v1390_v1  ;;  %v3693_v51 = vpop.trf.xlu1 }
 0x247   : > { %v3659_v26 = vadd.f32 %v1285_v29, %v1268_v63  ;;  %v1489_v52 = vmax.f32 %v3652_v15, %v3641_v60  ;;  %v1722_v58 = vmul.f32 %v2230_v34, %v3562_v59  ;;  %v1672_v2 = vadd.f32 0.19563593, %v1655_v41 }
 0x248   : > { %v1806_v31 = vsel %vm1772_vm0, %v1789_v11, %v1755_v53  ;;  %v1395_v42 = vsel %vm1393_vm4, %v1394_v23, %v1392_v8  ;;  %v1622_v61 = vmul.f32 %v1605_v10, %v3636_v35  ;;  %v3671_v20 = vmul.f32 %v2529_v40, %v1504_v50  ;;  %v3703_v10 = vpop.trf.xlu0 }
 0x249   : > { %v1840_v14 = vsub.f32 3.1415927, %v1806_v31  ;;  %1436 = vst [vmem:[%s3130_s23 + $0x60] sm:$0xff] %v1395_v42  ;;  %2534 = vrsqrt.f32 %v3659_v26  ;;  %v1739_v21 = vadd.f32 0.99999565, %v1722_v58  ;;  %vm1773_vm6 = vcmp.gt.f32.partialorder %v3433_v44, %v3444_v17 }
 0x24a   : > { %vm1824_vm7 = vcmp.lt.f32.partialorder %v3426_v24, 0.0  ;;  %v1689_v43 = vmul.f32 %v1672_v2, %v3596_v13  ;;  %v1505_v37 = vmin.f32 %v3590_v5, %v3580_v6  ;;  %v2215_v59 = vadd.f32 -0.12123907, %v1622_v61 }
 0x24b   : > { %v1857_v57 = vsel %vm1823_vm3, %v1840_v14, %v1806_v31  ;;  %v3684_v50 = vmul.f32 %v3671_v20, %v3671_v20  ;;  %vm1398_vm8 = vcmp.eq.f32.partialorder %v3601_v62, inf  ;;  %v2531_v49 = vpop.eup %2530  ;;  %v1756_v29 = vmul.f32 %v1739_v21, %v3547_v46 }
 0x24c   : > { %v1891_v18 = vsub.f32 0.0, %v1857_v57  ;;  %v2231_v22 = vadd.f32 -0.3329946, %v1689_v43  ;;  %vm1400_vm9 = vcmp.eq.f32.partialorder %v3601_v62, 0.0  ;;  %vm1875_vm10 = vcmp.lt.f32.partialorder %v3420_v36, 0.0 }
 0x24d   : > { %v1656_v30 = vmul.f32 %v2215_v59, %v3636_v35  ;;  %v1589_v53 = vmul.f32 -0.01348047, %v3684_v50  ;;  %v1397_v33 = vmul.f32 %v2531_v49, %v3601_v62  ;;  %v1523_v9 = vmax.f32 %v1489_v52, 1e-30 }
 0x24e   : > { %v1908_v1 = vsel %vm1874_vm5, %v1891_v18, %v1857_v57  ;;  %v1790_v63 = vsub.f32 1.5707964, %v1756_v29  ;;  %v1723_v46 = vmul.f32 %v2231_v22, %v3596_v13  ;;  %v1401_v11 = vand.u32 2147483648, %v3601_v62 }
 0x24f   : > { %1925 = vst [vmem:[%s3341_s22 + $0x40] sm:$0xff] %v1908_v1  ;;  %v1673_v34 = vadd.f32 0.19563593, %v1656_v30  ;;  %v1606_v41 = vadd.f32 0.057477314, %v1589_v53  ;;  %v1399_v23 = vsel %vm1398_vm8, %v3601_v62, %v1397_v33  ;;  %2536 = vrcp.f32 %v1523_v9  ;;  %v2533_v8 = vpop.eup %2532 }
 0x250   : > { %v1807_v7 = vsel %vm1773_vm6, %v1790_v63, %v1756_v29  ;;  %v1740_v52 = vadd.f32 0.99999565, %v1723_v46  ;;  %v1402_v13 = vsel %vm1400_vm9, %v1401_v11, %v1399_v23  ;;  %v1286_v40 = vmul.f32 %v3693_v51, %v3693_v51 }
 0x251   : > { %v1841_v31 = vsub.f32 3.1415927, %v1807_v7  ;;  %v1690_v58 = vmul.f32 %v1673_v34, %v3636_v35  ;;  %v1623_v2 = vmul.f32 %v1606_v41, %v3684_v50  ;;  %1437 = vst [vmem:[%s3130_s23 + $0x68] sm:$0xff] %v1402_v13  ;;  %v3715_v42 = vmul.f32 %v2533_v8, %v1505_v37  ;;  %v3756_v34 = vpop.trf.xlu1  ;;  %v3764_v13 = vpop.trf.xlu0 }
 0x252   : > { %v1757_v14 = vmul.f32 %v1740_v52, %v3582_v19  ;;  %vm1825_vm11 = vcmp.lt.f32.partialorder %v3455_v27, 0.0  ;;  %v3720_v44 = vand.u32 2147483647, %v3693_v51  ;;  %v1269_v17 = vmul.f32 %v3703_v10, %v3703_v10 }
 0x253   : > { %v1858_v62 = vsel %vm1824_vm7, %v1841_v31, %v1807_v7  ;;  %vm1876_vm12 = vcmp.lt.f32.partialorder %v3448_v12, 0.0  ;;  %v2232_v61 = vadd.f32 -0.3329946, %v1690_v58  ;;  %v2216_v21 = vadd.f32 -0.12123907, %v1623_v2 }
 0x254   : > { %v3729_v43 = vmul.f32 %v3715_v42, %v3715_v42  ;;  %v1892_v19 = vsub.f32 0.0, %v1858_v62  ;;  %v1791_v37 = vsub.f32 1.5707964, %v1757_v14  ;;  %v3731_v57 = vadd.f32 %v1286_v40, %v1269_v17 }
 0x255   : > { %v3734_v59 = vand.u32 2147483647, %v3703_v10  ;;  %vm1774_vm13 = vcmp.gt.f32.partialorder %v3462_v47, %v3469_v48  ;;  %v1724_v24 = vmul.f32 %v2232_v61, %v3636_v35  ;;  %v1657_v49 = vmul.f32 %v2216_v21, %v3684_v50 }
 0x256   : > { %v1590_v18 = vmul.f32 -0.01348047, %v3729_v43  ;;  %v2535_v29 = vpop.eup %2534  ;;  %v1909_v22 = vsel %vm1875_vm10, %v1892_v19, %v1858_v62  ;;  %v1808_v30 = vsel %vm1774_vm13, %v1791_v37, %v1757_v14  ;;  %vm1405_vm14 = vcmp.eq.f32.partialorder %v3659_v26, inf }
 0x257   : > { %2538 = vrsqrt.f32 %v3731_v57  ;;  %1926 = vst [vmem:[%s3341_s22 + $0x48] sm:$0xff] %v1909_v22  ;;  %v1842_v53 = vsub.f32 3.1415927, %v1808_v30  ;;  %v1741_v33 = vadd.f32 0.99999565, %v1724_v24  ;;  %v1404_v47 = vmul.f32 %v2535_v29, %v3659_v26 }
 0x258   : > { %v1674_v9 = vadd.f32 0.19563593, %v1657_v49  ;;  %v1607_v48 = vadd.f32 0.057477314, %v1590_v18  ;;  %vm1407_vm15 = vcmp.eq.f32.partialorder %v3659_v26, 0.0  ;;  %v1408_v35 = vand.u32 2147483648, %v3659_v26 }
 0x259   : > { %v1490_v36 = vmax.f32 %v3734_v59, %v3720_v44  ;;  %v1859_v1 = vsel %vm1825_vm11, %v1842_v53, %v1808_v30  ;;  %v1758_v63 = vmul.f32 %v1741_v33, %v3624_v16  ;;  %v1406_v11 = vsel %vm1405_vm14, %v3659_v26, %v1404_v47 }
 0x25a   : > { %v1691_v46 = vmul.f32 %v1674_v9, %v3684_v50  ;;  %v1893_v41 = vsub.f32 0.0, %v1859_v1  ;;  %vm1775_vm0 = vcmp.gt.f32.partialorder %v3497_v0, %v3506_v54  ;;  %v1624_v23 = vmul.f32 %v1607_v48, %v3729_v43 }
 0x25b   : > { %v1409_v8 = vsel %vm1407_vm15, %v1408_v35, %v1406_v11  ;;  %v1792_v7 = vsub.f32 1.5707964, %v1758_v63  ;;  %v1506_v27 = vmin.f32 %v3652_v15, %v3641_v60  ;;  %v1524_v16 = vmax.f32 %v1490_v36, 1e-30 }
 0x25c   : > { %v2233_v52 = vadd.f32 -0.3329946, %v1691_v46  ;;  %1438 = vst [vmem:[%s3130_s23 + $0x70] sm:$0xff] %v1409_v8  ;;  %v2537_v26 = vpop.eup %2536  ;;  %v1910_v40 = vsel %vm1876_vm12, %v1893_v41, %v1859_v1  ;;  %v2217_v31 = vadd.f32 -0.12123907, %v1624_v23  ;;  %v1287_v0 = vmul.f32 %v3756_v34, %v3756_v34 }
 0x25d   : > { %v3771_v54 = vand.u32 2147483647, %v3756_v34  ;;  %1927 = vst [vmem:[%s3341_s22 + $0x50] sm:$0xff] %v1910_v40  ;;  %v1809_v58 = vsel %vm1775_vm0, %v1792_v7, %v1758_v63  ;;  %v3775_v14 = vmul.f32 %v2537_v26, %v1506_v27  ;;  %2540 = vrcp.f32 %v1524_v16 }
 0x25e   : > { %v1725_v2 = vmul.f32 %v2233_v52, %v3684_v50  ;;  %v1843_v17 = vsub.f32 3.1415927, %v1809_v58  ;;  %v1658_v62 = vmul.f32 %v2217_v31, %v3729_v43  ;;  %v1270_v12 = vmul.f32 %v3764_v13, %v3764_v13 }
 0x25f   : > { %vm1826_vm1 = vcmp.lt.f32.partialorder %v3490_v3, 0.0  ;;  %v1574_v21 = vmul.f32 %v3775_v14, %v3775_v14  ;;  %v3784_v19 = vand.u32 2147483647, %v3764_v13  ;;  %vm1877_vm2 = vcmp.lt.f32.partialorder %v3474_v25, 0.0 }
 0x260   : > { %v1742_v61 = vadd.f32 0.99999565, %v1725_v2  ;;  %v1860_v50 = vsel %vm1826_vm1, %v1843_v17, %v1809_v58  ;;  %v1675_v37 = vadd.f32 0.19563593, %v1658_v62  ;;  %v3786_v24 = vadd.f32 %v1287_v0, %v1270_v12 }
 0x261   : > { %v1894_v49 = vsub.f32 0.0, %v1860_v50  ;;  %v1591_v29 = vmul.f32 -0.01348047, %v1574_v21  ;;  %v1491_v22 = vmax.f32 %v3784_v19, %v3771_v54  ;;  %vm1776_vm3 = vcmp.gt.f32.partialorder %v3532_v28, %v3537_v56 }
 0x262   : > { %v1759_v18 = vmul.f32 %v1742_v61, %v3671_v20  ;;  %v1692_v3 = vmul.f32 %v1675_v37, %v3729_v43  ;;  %2542 = vrsqrt.f32 %v3786_v24  ;;  %vm1412_vm4 = vcmp.eq.f32.partialorder %v3731_v57, inf }
 0x263   : > { %v1911_v53 = vsel %vm1877_vm2, %v1894_v49, %v1860_v50  ;;  %v1608_v9 = vadd.f32 0.057477314, %v1591_v29  ;;  %v1525_v48 = vmax.f32 %v1491_v22, 1e-30  ;;  %vm1414_vm5 = vcmp.eq.f32.partialorder %v3731_v57, 0.0 }
 0x264   : > { %v2539_v30 = vpop.eup %2538  ;;  %v1793_v33 = vsub.f32 1.5707964, %v1759_v18  ;;  %1928 = vst [vmem:[%s3341_s22 + $0x58] sm:$0xff] %v1911_v53  ;;  %v2234_v47 = vadd.f32 -0.3329946, %v1692_v3  ;;  %v1415_v36 = vand.u32 2147483648, %v3731_v57  ;;  %v1507_v7 = vmin.f32 %v3734_v59, %v3720_v44 }
 0x265   : > { %v1411_v20 = vmul.f32 %v2539_v30, %v3731_v57  ;;  %v1625_v35 = vmul.f32 %v1608_v9, %v1574_v21  ;;  %2544 = vrcp.f32 %v1525_v48  ;;  %vm1827_vm6 = vcmp.lt.f32.partialorder %v3522_v39, 0.0 }
 0x266   : > { %v1810_v25 = vsel %vm1776_vm3, %v1793_v33, %v1759_v18  ;;  %v1726_v63 = vmul.f32 %v2234_v47, %v3729_v43  ;;  %vm1878_vm7 = vcmp.lt.f32.partialorder %v3515_v32, 0.0  ;;  %vm1777_vm8 = vcmp.gt.f32.partialorder %v3580_v6, %v3590_v5 }
 0x267   : > { %v1844_v1 = vsub.f32 3.1415927, %v1810_v25  ;;  %v1413_v28 = vsel %vm1412_vm4, %v3731_v57, %v1411_v20  ;;  %v2218_v56 = vadd.f32 -0.12123907, %v1625_v35  ;;  %vm1828_vm9 = vcmp.lt.f32.partialorder %v3576_v45, 0.0 }
 0x268   : > { %v1416_v46 = vsel %vm1414_vm5, %v1415_v36, %v1413_v28  ;;  %v1743_v41 = vadd.f32 0.99999565, %v1726_v63  ;;  %vm1419_vm10 = vcmp.eq.f32.partialorder %v3786_v24, inf  ;;  %v1422_v62 = vand.u32 2147483648, %v3786_v24 }
 0x269   : > { %v1861_v11 = vsel %vm1827_vm6, %v1844_v1, %v1810_v25  ;;  %1439 = vst [vmem:[%s3130_s23 + $0x78] sm:$0xff] %v1416_v46  ;;  %v1659_v8 = vmul.f32 %v2218_v56, %v1574_v21  ;;  %vm1421_vm11 = vcmp.eq.f32.partialorder %v3786_v24, 0.0  ;;  %v1508_v61 = vmin.f32 %v3784_v19, %v3771_v54 }
 0x26a   : > { %v1895_v23 = vsub.f32 0.0, %v1861_v11  ;;  %v2541_v52 = vpop.eup %2540  ;;  %v1760_v43 = vmul.f32 %v1743_v41, %v3715_v42  ;;  %vm1879_vm12 = vcmp.lt.f32.partialorder %v3558_v4, 0.0 }
 0x26b   : > { %v1676_v27 = vadd.f32 0.19563593, %v1659_v8  ;;  %v3809_v39 = vmul.f32 %v2541_v52, %v1507_v7 }
 0x26c   : > { %v1912_v57 = vsel %vm1878_vm7, %v1895_v23, %v1861_v11  ;;  %v1794_v16 = vsub.f32 1.5707964, %v1760_v43 }
 0x26d   : > { %1929 = vst [vmem:[%s3341_s22 + $0x60] sm:$0xff] %v1912_v57  ;;  %v1693_v26 = vmul.f32 %v1676_v27, %v1574_v21  ;;  %v3816_v40 = vmul.f32 %v3809_v39, %v3809_v39 }
 0x26e   : > { %v1811_v31 = vsel %vm1777_vm8, %v1794_v16, %v1760_v43 }
 0x26f   : > { %v2543_v32 = vpop.eup %2542  ;;  %v1845_v42 = vsub.f32 3.1415927, %v1811_v31  ;;  %v2235_v0 = vadd.f32 -0.3329946, %v1693_v26  ;;  %v1592_v58 = vmul.f32 -0.01348047, %v3816_v40 }
 0x270   : > { %v1418_v2 = vmul.f32 %v2543_v32, %v3786_v24 }
 0x271   : > { %v1862_v6 = vsel %vm1828_vm9, %v1845_v42, %v1811_v31  ;;  %v1727_v5 = vmul.f32 %v2235_v0, %v1574_v21  ;;  %v1609_v17 = vadd.f32 0.057477314, %v1592_v58 }
 0x272   : > { %v1896_v12 = vsub.f32 0.0, %v1862_v6  ;;  %v1420_v45 = vsel %vm1419_vm10, %v3786_v24, %v1418_v2  ;;  %v2545_v21 = vpop.eup %2544 }
 0x273   : > { %v1744_v50 = vadd.f32 0.99999565, %v1727_v5  ;;  %v1626_v37 = vmul.f32 %v1609_v17, %v3816_v40  ;;  %v1423_v49 = vsel %vm1421_vm11, %v1422_v62, %v1420_v45  ;;  %v3841_v29 = vmul.f32 %v2545_v21, %v1508_v61 }
 0x274   : > { %v1913_v18 = vsel %vm1879_vm12, %v1896_v12, %v1862_v6  ;;  %1440 = vst [vmem:[%s3130_s23 + $0x80] sm:$0xff] %v1423_v49 }
 0x275   : > { %1930 = vst [vmem:[%s3341_s22 + $0x68] sm:$0xff] %v1913_v18  ;;  %v1761_v24 = vmul.f32 %v1744_v50, %v3775_v14  ;;  %v2219_v22 = vadd.f32 -0.12123907, %v1626_v37 }
 0x276   : > { %2642 = shalt.err (!%p2639_p6)
}
 0x277   : > { %s2643_s26 = scalar_lea.hbm %s3830_s8, 2176  ;;  %s2647_s20 = scalar_lea.hbm %s3953_s3, 4352 }
 0x278   : > { %p2644_p9 = scmp.ne.s32.totalorder %s3830_s8, %s2643_s26  ;;  %p2648_p3 = scmp.lt.s32.totalorder %s3830_s8, %s3953_s3 }
 0x279   : > { %p2649_p5 = scmp.lt.s32.totalorder %s2647_s20, %s2643_s26 }
 0x27a   : > { %p2645_p12 = pnand %p2644_p9, %p2864_p0 }
 0x27b   : > { %p2650_p1 = por %p2649_p5, %p2648_p3 }
 0x27c   : > { %p2646_p13 = pneg %p2645_p12 }
 0x27e   : > { %p2651_p4 = pnand %p2650_p1, %p2646_p13 }
 0x280   : > { %2654 = shalt.err (!%p2651_p4)
}
 0x281   : > { %s2757_s24 = smov 128   ;;  %s2758_s25 = smov 8   ;;  %v1576_v4 = vmul.f32 %v3841_v29, %v3841_v29  ;;  %v1795_v14 = vsub.f32 1.5707964, %v1761_v24  ;;  %v1660_v3 = vmul.f32 %v2219_v22, %v3816_v40  ;;  %vm1778_vm13 = vcmp.gt.f32.partialorder %v3641_v60, %v3652_v15 }
 0x282   : > { %2293 = dma.vmem_to_hbm [thread:$0]  (%p2864_p0), %s3836_s28, 2176, %s3830_s8, %s1935_s30, %s2757_s24, %s2757_s24, %s2758_s25   ;;  %vm1829_vm14 = vcmp.lt.f32.partialorder %v3631_v38, 0.0  ;;  %vm1880_vm15 = vcmp.lt.f32.partialorder %v3619_v55, 0.0  ;;  %vm1779_vm0 = vcmp.gt.f32.partialorder %v3720_v44, %v3734_v59  ;;  %vm1830_vm1 = vcmp.lt.f32.partialorder %v3703_v10, 0.0 }
 0x283   : > { %v1593_v30 = vmul.f32 -0.01348047, %v1576_v4  ;;  %v1812_v53 = vsel %vm1778_vm13, %v1795_v14, %v1761_v24  ;;  %v1677_v33 = vadd.f32 0.19563593, %v1660_v3  ;;  %vm1881_vm2 = vcmp.lt.f32.partialorder %v3693_v51, 0.0  ;;  %s1971_s14 = sshll.u32 %s3341_s22, 4  ;;  %s3898_s28 = scalar_lea.hbm %s3954_s4, %s2283_s27  ;;  %s3900_s14 = int_to_ptr.vmem [resolvable:$true] %s1971_s14 }
 0x284   : > { %v1846_v9 = vsub.f32 3.1415927, %v1812_v53  ;;  %vm1780_vm3 = vcmp.gt.f32.partialorder %v3771_v54, %v3784_v19  ;;  %vm1831_vm4 = vcmp.lt.f32.partialorder %v3764_v13, 0.0  ;;  %vm1882_vm5 = vcmp.lt.f32.partialorder %v3756_v34, 0.0  ;;  %s1940_s6 = scalar_lea.sflag [#allocation11], %s2911_s0  ;;  %s2655_s7 = scalar_lea.vmem %s3900_s14, 2176 }
 0x285   : > { %v1610_v47 = vadd.f32 0.057477314, %v1593_v30  ;;  %v1694_v20 = vmul.f32 %v1677_v33, %v3816_v40  ;;  %p2656_p8 = scmp.ne.s32.totalorder %s3900_s14, %s2655_s7  ;;  %s2759_s8 = smov [#allocation10]  }
 0x286   : > { %v1863_v48 = vsel %vm1829_vm14, %v1846_v9, %v1812_v53  ;;  %s2659_s18 = sshll.u32 %s2759_s8, 4  ;;  %s2660_s18 = int_to_ptr.vmem [resolvable:$false] %s2659_s18 }
 0x287   : > { %v1627_v25 = vmul.f32 %v1610_v47, %v1576_v4  ;;  %v1897_v35 = vsub.f32 0.0, %v1863_v48  ;;  %v2236_v36 = vadd.f32 -0.3329946, %v1694_v20  ;;  %p2657_p11 = pnand %p2656_p8, %p2864_p0  ;;  %s2661_s30 = scalar_lea.vmem %s2660_s18, 4352 }
 0x288   : > { %p2662_p2 = scmp.lt.s32.totalorder %s3900_s14, %s2660_s18  ;;  %p2663_p6 = scmp.lt.s32.totalorder %s2661_s30, %s2655_s7 }
 0x289   : > { %v2220_v1 = vadd.f32 -0.12123907, %v1627_v25  ;;  %v1914_v63 = vsel %vm1880_vm15, %v1897_v35, %v1863_v48  ;;  %v1728_v60 = vmul.f32 %v2236_v36, %v3816_v40  ;;  %p2658_p7 = pneg %p2657_p11 }
 0x28a   : > { %1931 = vst [vmem:[%s3341_s22 + $0x70] sm:$0xff] %v1914_v63  ;;  %p2664_p9 = por %p2663_p6, %p2662_p2 }
 0x28b   : > { %v1661_v15 = vmul.f32 %v2220_v1, %v1576_v4  ;;  %v1745_v28 = vadd.f32 0.99999565, %v1728_v60 }
 0x28c   : > { %p2665_p12 = pnand %p2664_p9, %p2658_p7 }
 0x28d   : > { %v1678_v56 = vadd.f32 0.19563593, %v1661_v15  ;;  %v1762_v46 = vmul.f32 %v1745_v28, %v3809_v39 }
 0x28f   : > { %v1695_v38 = vmul.f32 %v1678_v56, %v1576_v4  ;;  %v1796_v11 = vsub.f32 1.5707964, %v1762_v46 }
 0x291   : > { %v2237_v41 = vadd.f32 -0.3329946, %v1695_v38  ;;  %v1813_v23 = vsel %vm1779_vm0, %v1796_v11, %v1762_v46 }
 0x292   : > { %v1847_v55 = vsub.f32 3.1415927, %v1813_v23 }
 0x293   : > { %v1729_v8 = vmul.f32 %v2237_v41, %v1576_v4 }
 0x294   : > { %v1864_v7 = vsel %vm1830_vm1, %v1847_v55, %v1813_v23 }
 0x295   : > { %v1746_v52 = vadd.f32 0.99999565, %v1729_v8  ;;  %v1898_v43 = vsub.f32 0.0, %v1864_v7 }
 0x297   : > { %v1763_v57 = vmul.f32 %v1746_v52, %v3841_v29  ;;  %v1915_v27 = vsel %vm1881_vm2, %v1898_v43, %v1864_v7 }
 0x298   : > { %1932 = vst [vmem:[%s3341_s22 + $0x78] sm:$0xff] %v1915_v27 }
 0x299   : > { %v1797_v44 = vsub.f32 1.5707964, %v1763_v57 }
 0x29b   : > { %v1814_v59 = vsel %vm1780_vm3, %v1797_v44, %v1763_v57 }
 0x29c   : > { %v1848_v39 = vsub.f32 3.1415927, %v1814_v59 }
 0x29e   : > { %v1865_v10 = vsel %vm1831_vm4, %v1848_v39, %v1814_v59 }
 0x29f   : > { %v1899_v16 = vsub.f32 0.0, %v1865_v10 }
 0x2a1   : > { %v1916_v51 = vsel %vm1882_vm5, %v1899_v16, %v1865_v10 }
 0x2a2   : > { %1933 = vst [vmem:[%s3341_s22 + $0x80] sm:$0xff] %v1916_v51 }
 0x2a3   : > { %2668 = shalt.err (!%p2665_p12)
}
 0x2a4   : > { %s2669_s22 = scalar_lea.hbm %s3898_s28, 2176  ;;  %s2673_s5 = scalar_lea.hbm %s3954_s4, 4352 }
 0x2a5   : > { %p2670_p13 = scmp.ne.s32.totalorder %s3898_s28, %s2669_s22  ;;  %p2674_p1 = scmp.lt.s32.totalorder %s3898_s28, %s3954_s4 }
 0x2a6   : > { %p2675_p4 = scmp.lt.s32.totalorder %s2673_s5, %s2669_s22 }
 0x2a7   : > { %p2671_p3 = pnand %p2670_p13, %p2864_p0 }
 0x2a8   : > { %p2676_p8 = por %p2675_p4, %p2674_p1 }
 0x2a9   : > { %p2672_p5 = pneg %p2671_p3 }
 0x2ab   : > { %p2677_p11 = pnand %p2676_p8, %p2672_p5 }
 0x2ad   : > { %2680 = shalt.err (!%p2677_p11)
}
 0x2ae   : > { %2294 = dma.vmem_to_hbm [thread:$0]  (%p2864_p0), %s3900_s14, 2176, %s3898_s28, %s1940_s6, %s2757_s24, %s2757_s24, %s2758_s25  }
 0x2af PF: > { %s3978_s9 = sld [smem:[#allocation19_spill]]  ;;  %s1986_s12 = sand.u32 1, %s2727_s15  }
 0x2b0   : > { %s3979_s26 = sld [smem:[#allocation18_spill]]  ;;  %s1987_s2 = scalar_lea.sflag [#allocation5], %s1986_s12 }
 0x2b5   : > { %p3980_p7 = scmp.ne.s32.totalorder %s3978_s9, 0 }
 0x2b7   : > { %p2309_p2 = pnand %p2131_p10, %p3980_p7 }
 0x2b9   : > { %p2310_p6 = pneg %p2309_p2 }
 0x2bb   : > { %2718 = dma.done.wait (%p2310_p6), %s1987_s2, 2176  }
 0x2bc   : > { %2720 = vsyncadd (%p2310_p6), %s1987_s2, 4294965120  ;;  %s1996_s20 = scalar_lea.sflag [#allocation11], %s1986_s12 }
 0x2bd   : > { %2722 = dma.done.wait (%p2310_p6), %s1996_s20, 2176  }
 0x2be   : > { %2724 = vsyncadd (%p2310_p6), %s1996_s20, 4294965120  ;;  %s27_s20 = sadd.s32 1, %s3979_s26   ;;  %s3981_s10 = sld [smem:[#allocation17_spill]] }
 0x2bf   : > { %p24_p9 = scmp.ge.s32.totalorder %s27_s20, 4   ;;  %s3982_s17 = sld [smem:[#allocation21_spill]] }
 0x2c0   : > { %s3983_s29 = sld [smem:[#allocation20_spill]]  ;;  %s3984_s15 = smov %s2731_s16 }
 0x2c1   : > { %s3986_s18 = smov %s2743_s19 }
 0x2c2   :  { %26 = sbr.rel (!%p24_p9) target bundleno = 13 (0xd), region = 111 }
 0x2c4   : > { %s3985_s16 = smov %s3981_s10 }
 0x2c6   : > { %s3987_s19 = smov %s3983_s29 }
 0x2c7   :  { %2001 = vsyncpa [#allocation4], 1 }
 0x2c8   :  { %2003 = vsyncpa [#allocation4 + $0x1], 1 }
 0x2c9   :  { %2004 = vsyncpa [#allocation7], 1 }
 0x2ca   :  { %2006 = vsyncpa [#allocation7 + $0x1], 1 }
 0x2cb   :  { %2007 = vsyncpa [#allocation5], 1 }
 0x2cc   :  { %2009 = vsyncpa [#allocation5 + $0x1], 1 }
 0x2cd   :  { %2010 = vsyncpa [#allocation11], 1 }
 0x2ce   :  { %2012 = vsyncpa [#allocation11 + $0x1], 1 }

</bundles_post_ra>
